<compile_context>
chip_gen: v5e
topology: v5e:2x2
jax: 0.10.0
libtpu: 0.0.40
codegen_flags: <defaults>
</compile_context>

<pallas_src>
import jax
import jax.numpy as jnp
from jax.experimental import pallas as pl
from jax.experimental.pallas import tpu as pltpu


def _attention_block_kernel(x_ref, w1_ref, w2_ref, bag_ref, attn_ref):
    x2 = x_ref[...]                                   # (bt*N, d_in), input dtype
    w1 = w1_ref[...]                                  # (d_in, d_attn)
    w2 = w2_ref[...]                                  # (1, d_attn)

    d_in, bt = bag_ref.shape                          # squeezed output block (d_in, bt)
    n = attn_ref.shape[0]                             # (N, bt)
    d_attn = w1.shape[1]

    # --- Linear(d_in -> d_attn) on the MXU, bags folded into rows to fill it. ---
    # precision=HIGHEST: keep true f32 MXU passes (parity with PyTorch f32 Linear).
    h = jnp.tanh(
        jnp.dot(
            x2.astype(jnp.float32),
            w1.astype(jnp.float32),
            preferred_element_type=jnp.float32,
            precision=jax.lax.Precision.HIGHEST,
        )
    )                                                 # (bt*N, d_attn) f32

    # --- Linear(d_attn -> 1): output width 1 -> VPU mul + lane reduce, no MXU. ---
    # reshape only splits the sublane axis into 8-row (N) groups -> no relayout.
    h3 = h.reshape(bt, n, d_attn)                     # (bt, N, d_attn)
    s = jnp.sum(h3 * w2.astype(jnp.float32), axis=-1)  # (bt, N) f32

    # --- Softmax over the N instances of each bag (exact divide, matches torch). ---
    m = jnp.max(s, axis=-1, keepdims=True)
    e = jnp.exp(s - m)
    a = e / jnp.sum(e, axis=-1, keepdims=True)        # (bt, N) f32

    # --- Bag embedding: weighted sum over instances (VPU, not an M=1 matmul). ---
    x3 = x2.reshape(bt, n, d_in).astype(jnp.float32)  # sublane-split reshape only
    bag = jnp.sum(a[:, :, None] * x3, axis=1)         # (bt, d_in) f32

    # TODO(synk): nn.Dropout is identity in eval mode; training-mode dropout would
    # use pltpu.prng_seed / pltpu.prng_random_bits to build a keep-mask here.

    # --- Lane-dense stores: bag axis on lanes (bt lanes per block). ---
    bag_ref[...] = bag.T.astype(bag_ref.dtype)        # (d_in, bt)
    attn_ref[...] = a.T.astype(attn_ref.dtype)        # (N, bt)


def _pick_bag_tile(B, N, d_in, d_attn, vmem_budget_bytes):
    """Largest bag tile that fits the VMEM budget (f32 accounting, double buffers)."""
    per_bag = 4 * (3 * N * d_in + 2 * N * d_attn + 3 * d_in + 4 * N)
    cap = max(1, vmem_budget_bytes // per_bag)
    cap = min(cap, 1024)                 # bound temporaries; keep >1 step at huge B
    if B <= cap:
        return B                         # single block spans the whole batch
    # Prefer a multiple-of-128 divisor of B: unmasked (lane-dense) output stores.
    for bt in range((cap // 128) * 128, 0, -128):
        if B % bt == 0:
            return bt
    # Otherwise the largest divisor keeping the x block sublane-aligned.
    for bt in range(cap, 0, -1):
        if B % bt == 0 and (bt * N) % 8 == 0:
            return bt
    return B


def attention_block_forward(x, w1, w2, *, bags_per_step=None):
    """Batched AttentionBlock forward.

    x : (B, N, d_in)   -- B bags of N instances each
    w1: (d_in, d_attn) -- first Linear weight, pre-transposed
    w2: (1, d_attn)    -- second Linear weight (native PyTorch layout)

    Returns (bag_embeddings: (B, d_in), attn: (B, N)); row b of attn is the
    (1, N) transposed attention the PyTorch module returns for bag b.
    """
    B, N, d_in = x.shape
    d_attn = w1.shape[1]

    vmem_budget = 12 * 1024 * 1024       # tile-sizing budget; well under v7x scoped VMEM
    if bags_per_step is None:
        bt = _pick_bag_tile(B, N, d_in, d_attn, vmem_budget)
    else:
        bt = bags_per_step if (B % bags_per_step == 0 and
                               (bags_per_step * N) % 8 == 0) else B
    grid_len = B // bt

    # Wrapper-side flatten of x: free layout plumbing, keeps the MXU LHS contiguous.
    x2d = x.reshape(B * N, d_in)

    # Transposed (bag-axis-on-lanes) output slabs; wrapper transposes back below.
    out_shapes = (
        jax.ShapeDtypeStruct((grid_len, d_in, bt), x.dtype),      # bag^T blocks
        jax.ShapeDtypeStruct((grid_len, N, bt), jnp.float32),     # attn^T blocks
    )

    bag_t, attn_t = pl.pallas_call(
        _attention_block_kernel,
        out_shape=out_shapes,
        grid=(grid_len,),
        in_specs=[
            pl.BlockSpec((bt * N, d_in), lambda g: (g, 0)),
            # Weights: same block every grid step -> DMA'd once, VMEM-resident.
            pl.BlockSpec((d_in, d_attn), lambda g: (0, 0)),
            pl.BlockSpec((1, d_attn), lambda g: (0, 0)),
        ],
        out_specs=(
            pl.BlockSpec((None, d_in, bt), lambda g: (g, 0, 0)),
            pl.BlockSpec((None, N, bt), lambda g: (g, 0, 0)),
        ),
        compiler_params=pltpu.CompilerParams(
            dimension_semantics=("parallel",),
            vmem_limit_bytes=32 * 1024 * 1024,
        ),
    )(x2d, w1, w2)

    # Cheap wrapper transposes of the small outputs back to module layout.
    bag = bag_t.transpose(0, 2, 1).reshape(B, d_in)
    attn = attn_t.transpose(0, 2, 1).reshape(B, N)
    return bag, attn


def _reference_batched(x, w1, w2):
    with jax.default_matmul_precision("highest"):
        h = jnp.tanh(jnp.einsum("bnd,da->bna", x, w1))
        s = jnp.einsum("bna,a->bn", h, w2[0])
        a = jax.nn.softmax(s, axis=-1)
        bag = jnp.einsum("bn,bnd->bd", a, x)
    return bag, a


if __name__ == "__main__":
    # Small shapes implied by the module: bags of N=8 instances, d_in=32, d_attn=16,
    # batched over B=16 bags (fits one grid step at these sizes).
    B, N, D_IN, D_ATTN = 16, 8, 32, 16
    DROPOUT_P = 0.25  # unused at inference (eval mode -> identity)

    key = jax.random.PRNGKey(0)
    kx, k1, k2 = jax.random.split(key, 3)

    x = jax.random.normal(kx, (B, N, D_IN), dtype=jnp.float32)
    w1 = (jax.random.uniform(k1, (D_IN, D_ATTN), dtype=jnp.float32) - 0.5) * (2.0 / jnp.sqrt(D_IN))
    w2 = (jax.random.uniform(k2, (1, D_ATTN), dtype=jnp.float32) - 0.5) * (2.0 / jnp.sqrt(D_ATTN))

    bag, attn = attention_block_forward(x, w1, w2)
    bag = jax.block_until_ready(bag)
    attn = jax.block_until_ready(attn)

    bag_ref, attn_ref = _reference_batched(x, w1, w2)
    assert bag.shape == (B, D_IN) and attn.shape == (B, N)
    assert jnp.allclose(bag, bag_ref, atol=1e-3, rtol=1e-3)
    assert jnp.allclose(attn, attn_ref, atol=1e-3, rtol=1e-3)
    assert jnp.allclose(jnp.sum(attn, axis=-1), jnp.ones((B,)), atol=1e-4)

    # Per-bag check against the original single-bag PyTorch semantics.
    with jax.default_matmul_precision("highest"):
        bag0_ref = jax.nn.softmax(jnp.tanh(x[0] @ w1) @ w2.T, axis=0).T @ x[0]
    assert jnp.allclose(bag[0:1], bag0_ref, atol=1e-3, rtol=1e-3)

    print("KERNEL_OK")
</pallas_src>

<mosaic_0001>
module attributes {stable_mosaic.version = 11 : i64} {
  func.func @_attention_block_kernel(%arg0: i32, %arg1: memref<128x32xf32, #tpu.memory_space<vmem>>, %arg2: memref<32x16xf32, #tpu.memory_space<vmem>>, %arg3: memref<1x16xf32, #tpu.memory_space<vmem>>, %arg4: memref<1x32x16xf32, #tpu.memory_space<vmem>>, %arg5: memref<1x8x16xf32, #tpu.memory_space<vmem>>) attributes {dimension_semantics = [#tpu.dimension_semantics<parallel>], iteration_bounds = array<i64: 1>, scalar_prefetch = 0 : i64, scratch_operands = 0 : i64, tpu.core_type = #tpu.core_type<tc>, window_params = [{transform_indices = @transform_0, window_bounds = array<i64: 128, 32>}, {pipeline_mode = #tpu.pipeline_mode<synchronous>, transform_indices = @transform_1, window_bounds = array<i64: 32, 16>}, {pipeline_mode = #tpu.pipeline_mode<synchronous>, transform_indices = @transform_2, window_bounds = array<i64: 1, 16>}, {transform_indices = @transform_3, window_bounds = array<i64: 1, 32, 16>}, {transform_indices = @transform_4, window_bounds = array<i64: 1, 8, 16>}]} {
    %c0 = arith.constant 0 : index
    %c0_0 = arith.constant 0 : index
    %0 = vector.load %arg1[%c0, %c0_0] : memref<128x32xf32, #tpu.memory_space<vmem>>, vector<128x32xf32>
    %c0_1 = arith.constant 0 : index
    %c0_2 = arith.constant 0 : index
    %1 = vector.load %arg2[%c0_1, %c0_2] : memref<32x16xf32, #tpu.memory_space<vmem>>, vector<32x16xf32>
    %c0_3 = arith.constant 0 : index
    %c0_4 = arith.constant 0 : index
    %2 = vector.load %arg3[%c0_3, %c0_4] : memref<1x16xf32, #tpu.memory_space<vmem>>, vector<1x16xf32>
    %cst = arith.constant dense<0.000000e+00> : vector<128x16xf32>
    %3 = tpu.matmul %0, %1, %cst {dimension_numbers = #tpu.dot_dimension_numbers<[1], [0], [0], [1], [0, 0, 1, 1], [], []>, precision = #tpu.contract_precision<fp32>} : vector<128x32xf32>, vector<32x16xf32>, vector<128x16xf32> -> vector<128x16xf32>
    %4 = math.tanh %3 : vector<128x16xf32>
    %5 = vector.shape_cast %4 : vector<128x16xf32> to vector<16x8x16xf32>
    %6 = vector.shape_cast %2 : vector<1x16xf32> to vector<1x1x16xf32>
    %7 = vector.broadcast %6 : vector<1x1x16xf32> to vector<16x8x16xf32>
    %8 = arith.mulf %5, %7 : vector<16x8x16xf32>
    %cst_5 = arith.constant dense<0.000000e+00> : vector<16x8xf32>
    %9 = vector.multi_reduction <add>, %8, %cst_5 [2] : vector<16x8x16xf32> to vector<16x8xf32>
    %cst_6 = arith.constant dense<0xFF800000> : vector<16xf32>
    %10 = vector.multi_reduction <maximumf>, %9, %cst_6 [1] : vector<16x8xf32> to vector<16xf32>
    %11 = vector.shape_cast %10 : vector<16xf32> to vector<16x1xf32>
    %12 = vector.broadcast %11 : vector<16x1xf32> to vector<16x8xf32>
    %13 = arith.subf %9, %12 : vector<16x8xf32>
    %14 = math.exp %13 : vector<16x8xf32>
    %cst_7 = arith.constant dense<0.000000e+00> : vector<16xf32>
    %15 = vector.multi_reduction <add>, %14, %cst_7 [1] : vector<16x8xf32> to vector<16xf32>
    %16 = vector.shape_cast %15 : vector<16xf32> to vector<16x1xf32>
    %17 = vector.broadcast %16 : vector<16x1xf32> to vector<16x8xf32>
    %18 = arith.divf %14, %17 : vector<16x8xf32>
    %19 = vector.shape_cast %0 : vector<128x32xf32> to vector<16x8x32xf32>
    %20 = vector.shape_cast %18 : vector<16x8xf32> to vector<16x8x1xf32>
    %21 = vector.broadcast %20 : vector<16x8x1xf32> to vector<16x8x32xf32>
    %22 = arith.mulf %21, %19 : vector<16x8x32xf32>
    %cst_8 = arith.constant dense<0.000000e+00> : vector<16x32xf32>
    %23 = vector.multi_reduction <add>, %22, %cst_8 [1] : vector<16x8x32xf32> to vector<16x32xf32>
    %24 = tpu.transpose %23, [1, 0] : vector<16x32xf32> -> vector<32x16xf32>
    %c0_9 = arith.constant 0 : index
    %c0_10 = arith.constant 0 : index
    %c0_11 = arith.constant 0 : index
    %25 = vector.load %arg4[%c0_9, %c0_10, %c0_11] : memref<1x32x16xf32, #tpu.memory_space<vmem>>, vector<1x32x16xf32>
    %26 = vector.shape_cast %25 : vector<1x32x16xf32> to vector<32x16xf32>
    %27 = vector.shape_cast %24 : vector<32x16xf32> to vector<1x32x16xf32>
    tpu.vector_store %arg4[%c0_9, %c0_10, %c0_11], %27 {strides = array<i32>} : memref<1x32x16xf32, #tpu.memory_space<vmem>>, vector<1x32x16xf32>,
    %28 = tpu.transpose %18, [1, 0] : vector<16x8xf32> -> vector<8x16xf32>
    %c0_12 = arith.constant 0 : index
    %c0_13 = arith.constant 0 : index
    %c0_14 = arith.constant 0 : index
    %29 = vector.load %arg5[%c0_12, %c0_13, %c0_14] : memref<1x8x16xf32, #tpu.memory_space<vmem>>, vector<1x8x16xf32>
    %30 = vector.shape_cast %29 : vector<1x8x16xf32> to vector<8x16xf32>
    %31 = vector.shape_cast %28 : vector<8x16xf32> to vector<1x8x16xf32>
    tpu.vector_store %arg5[%c0_12, %c0_13, %c0_14], %31 {strides = array<i32>} : memref<1x8x16xf32, #tpu.memory_space<vmem>>, vector<1x8x16xf32>,
    return
  }
  func.func @transform_0(%arg0: i32) -> (i32, i32) {
    %c0_i32 = arith.constant 0 : i32
    %c0_i32_0 = arith.constant 0 : i32
    return %arg0, %c0_i32 : i32, i32
  }
  func.func @transform_1(%arg0: i32) -> (i32, i32) {
    %c0_i32 = arith.constant 0 : i32
    %c0_i32_0 = arith.constant 0 : i32
    %c0_i32_1 = arith.constant 0 : i32
    return %c0_i32, %c0_i32_0 : i32, i32
  }
  func.func @transform_2(%arg0: i32) -> (i32, i32) {
    %c0_i32 = arith.constant 0 : i32
    %c0_i32_0 = arith.constant 0 : i32
    %c0_i32_1 = arith.constant 0 : i32
    return %c0_i32, %c0_i32_0 : i32, i32
  }
  func.func @transform_3(%arg0: i32) -> (i32, i32, i32) {
    %c0_i32 = arith.constant 0 : i32
    %c0_i32_0 = arith.constant 0 : i32
    %c0_i32_1 = arith.constant 0 : i32
    return %arg0, %c0_i32, %c0_i32_0 : i32, i32, i32
  }
  func.func @transform_4(%arg0: i32) -> (i32, i32, i32) {
    %c0_i32 = arith.constant 0 : i32
    %c0_i32_0 = arith.constant 0 : i32
    %c0_i32_1 = arith.constant 0 : i32
    return %arg0, %c0_i32, %c0_i32_0 : i32, i32, i32
  }
}

</mosaic_0001>

<bundles_post_ra>
// kernel: tpu_custom_call.1
= control target key start
LH: loop header
LB: loop body
LE: loop exit
PB: predicated region body
PF: predicated region fallthrough
CT: control target
= control target key end

     0   :  { %vm2836_vm0 = vcmask 261120   ;;  %s2823_s0 = inlined_call_operand.vmem [shape: f32[128,32], index: 0, kind: input, shape index: {}]   ;;  %s2824_s1 = inlined_call_operand.vmem [shape: f32[32,16], index: 1, kind: input, shape index: {}]   ;;  %s2825_s2 = inlined_call_operand.vmem [shape: f32[1,16], index: 2, kind: input, shape index: {}]   ;;  %s2826_s3 = inlined_call_operand.vmem [shape: f32[1,32,16], index: 3, kind: output, shape index: {0}]   ;;  %s2827_s4 = inlined_call_operand.hbm [shape: f32[1,8,16], index: 4, kind: output, shape index: {1}]  }
   0x1   :  { %v36_v0 = vld [vmem:[%s2824_s1 + $0x18] sm:$0xff]  ;;  %v35_v1 = vld [vmem:[%s2824_s1 + $0x10] sm:$0xff]  ;;  %v34_v2 = vld [vmem:[%s2824_s1 + $0x8] sm:$0xff] }
   0x2   :  { %v1893_v3 = vand.u32 4294901760, %v36_v0  ;;  %v1895_v4 = vand.u32 4294901760, %v35_v1  ;;  %v1897_v5 = vand.u32 4294901760, %v34_v2  ;;  %v33_v6 = vld [vmem:[%s2824_s1] sm:$0xff]  ;;  %v26_v8 = vld [vmem:[%s2823_s0 + $0x48] sm:$0xff]  ;;  %v27_v13 = vld [vmem:[%s2823_s0 + $0x50] sm:$0xff] }
   0x3   :  { %v25_v7 = vld [vmem:[%s2823_s0 + $0x40] sm:$0xff]  ;;  %v1908_v9 = vand.u32 4294901760, %v33_v6  ;;  %v67_v11 = vsel %vm2836_vm0, %v26_v8, 0  ;;  %v70_v21 = vsel %vm2836_vm0, %v27_v13, 0 }
   0x4   :  { %v64_v10 = vsel %vm2836_vm0, %v25_v7, 0  ;;  %v17_v12 = vld [vmem:[%s2823_s0] sm:$0xff]  ;;  %1704 = vmatpush.msra.mxu2 %v1893_v3  ;;  %v249_v14 = vsub.f32 %v36_v0, %v1893_v3  ;;  %v255_v16 = vsub.f32 %v35_v1, %v1895_v4  ;;  %v261_v17 = vsub.f32 %v34_v2, %v1897_v5  ;;  %100 = vmatpush.msra.mxu0 %v1893_v3 }
   0x5   :  { %v1920_v15 = vand.u32 4294901760, %v64_v10  ;;  %v1926_v18 = vsub.f32 %v33_v6, %v1908_v9  ;;  %v1928_v19 = vand.u32 4294901760, %v67_v11  ;;  %v40_v20 = vsel %vm2836_vm0, %v17_v12, 0 }
   0x6   :  { %1705 = vmatpush.msra.mxu2 %v1895_v4  ;;  %v250_v22 = vand.u32 4294901760, %v249_v14  ;;  %v256_v24 = vand.u32 4294901760, %v255_v16  ;;  %v262_v25 = vand.u32 4294901760, %v261_v17  ;;  %102 = vmatpush.msra.mxu0 %v1895_v4 }
   0x7   :  { %v1934_v23 = vsub.f32 %v64_v10, %v1920_v15 }
   0x8   :  { %10 = vsyncpa [#allocation3], 0  ;;  %v268_v26 = vand.u32 4294901760, %v1926_v18  ;;  %v1939_v27 = vsub.f32 %v67_v11, %v1928_v19  ;;  %v1941_v28 = vand.u32 4294901760, %v40_v20  ;;  %1706 = vmatpush.msra.mxu2 %v1897_v5  ;;  %v251_v29 = vsub.f32 %v249_v14, %v250_v22  ;;  %104 = vmatpush.msra.mxu0 %v1897_v5  ;;  %v18_v36 = vld [vmem:[%s2823_s0 + $0x8] sm:$0xff]  ;;  %v19_v37 = vld [vmem:[%s2823_s0 + $0x10] sm:$0xff] }
   0x9   :  { %v173_v30 = vand.u32 4294901760, %v1934_v23  ;;  %v257_v31 = vsub.f32 %v255_v16, %v256_v24  ;;  %v263_v32 = vsub.f32 %v261_v17, %v262_v25  ;;  %v1952_v35 = vand.u32 4294901760, %v70_v21  ;;  %v28_v46 = vld [vmem:[%s2823_s0 + $0x58] sm:$0xff]  ;;  %v29_v1 = vld [vmem:[%s2823_s0 + $0x60] sm:$0xff]  ;;  %s1693_s9 = sshll.u32 %s2827_s4, 4  ;;  %s1694_s9 = int_to_ptr.hbm [resolvable:$true] %s1693_s9 }
   0xa   :  { %v269_v33 = vsub.f32 %v1926_v18, %v268_v26  ;;  %v1950_v34 = vsub.f32 %v40_v20, %v1941_v28  ;;  %1707 = vmatpush.msra.mxu2 %v1908_v9  ;;  %v252_v38 = vand.u32 4294901760, %v251_v29  ;;  %v181_v41 = vand.u32 4294901760, %v1939_v27  ;;  %106 = vmatpush.msra.mxu0 %v1908_v9  ;;  %v20_v57 = vld [vmem:[%s2823_s0 + $0x18] sm:$0xff]  ;;  %v21_v11 = vld [vmem:[%s2823_s0 + $0x20] sm:$0xff] }
   0xb   :  { %v174_v39 = vsub.f32 %v1934_v23, %v173_v30  ;;  %v258_v40 = vand.u32 4294901760, %v257_v31  ;;  %v264_v44 = vand.u32 4294901760, %v263_v32  ;;  %v43_v45 = vsel %vm2836_vm0, %v18_v36, 0 }
   0xc   :  { %351 = vmatpush.msrb.mxu2 %v249_v14  ;;  %v109_v42 = vand.u32 4294901760, %v1950_v34  ;;  %574 = vmatpush.msrb.mxu0 %v250_v22  ;;  %v46_v47 = vsel %vm2836_vm0, %v19_v37, 0  ;;  %v1975_v49 = vand.u32 4294901760, %v43_v45  ;;  %v270_v50 = vand.u32 4294901760, %v269_v33  ;;  %v31_v37 = vld [vmem:[%s2823_s0 + $0x70] sm:$0xff] }
   0xd   :  { %1708 = vmatpush.msra.mxu3 %v252_v38  ;;  %v175_v43 = vand.u32 4294901760, %v174_v39  ;;  %253 = vmatpush.msra.mxu1 %v252_v38  ;;  %v182_v51 = vsub.f32 %v1939_v27, %v181_v41  ;;  %v1981_v52 = vsub.f32 %v70_v21, %v1952_v35  ;;  %v1983_v53 = vand.u32 4294901760, %v46_v47 }
   0xe   :  { %v110_v48 = vsub.f32 %v1950_v34, %v109_v42  ;;  %354 = vmatpush.msrb.mxu2 %v255_v16  ;;  %578 = vmatpush.msrb.mxu0 %v256_v24  ;;  %v1986_v55 = vsub.f32 %v43_v45, %v1975_v49  ;;  %v73_v56 = vsel %vm2836_vm0, %v28_v46, 0  ;;  %v49_v63 = vsel %vm2836_vm0, %v20_v57, 0  ;;  %v23_v46 = vld [vmem:[%s2823_s0 + $0x30] sm:$0xff]  ;;  %v32_v57 = vld [vmem:[%s2823_s0 + $0x78] sm:$0xff] }
   0xf   :  { %176 = vmatmul.f32.vlgmr.msra.gmra.mxu2 %v175_v43  ;;  %1709 = vmatpush.msra.mxu3 %v258_v40  ;;  %v1994_v59 = vsub.f32 %v46_v47, %v1983_v53  ;;  %v183_v60 = vand.u32 4294901760, %v182_v51  ;;  %v189_v61 = vand.u32 4294901760, %v1981_v52  ;;  %v1997_v62 = vand.u32 4294901760, %v73_v56 }
  0x10   :  { %259 = vmatpush.msra.mxu1 %v258_v40  ;;  %v111_v54 = vand.u32 4294901760, %v110_v48  ;;  %357 = vmatpush.msrb.mxu2 %v261_v17  ;;  %v117_v58 = vand.u32 4294901760, %v1986_v55  ;;  %v2012_v7 = vand.u32 4294901760, %v49_v63  ;;  %v52_v17 = vsel %vm2836_vm0, %v21_v11, 0 }
  0x11   :  { %1710 = vmatpush.msra.mxu3 %v264_v44  ;;  %582 = vmatpush.msrb.mxu0 %v262_v25  ;;  %v125_v6 = vand.u32 4294901760, %v1994_v59  ;;  %v190_v8 = vsub.f32 %v1981_v52, %v189_v61  ;;  %v2021_v10 = vsub.f32 %v73_v56, %v1997_v62  ;;  %v2048_v21 = vand.u32 4294901760, %v52_v17  ;;  %v22_v25 = vld [vmem:[%s2823_s0 + $0x28] sm:$0xff] }
  0x12   :  { %265 = vmatpush.msra.mxu1 %v264_v44  ;;  %112 = vmatmul.f32.vlgmr.msra.gmra.mxu0 %v111_v54  ;;  %v118_v0 = vsub.f32 %v1986_v55, %v117_v58  ;;  %v2033_v13 = vsub.f32 %v49_v63, %v2012_v7  ;;  %v55_v36 = vsel %vm2836_vm0, %v22_v25, 0  ;;  %v82_v45 = vsel %vm2836_vm0, %v31_v37, 0 }
  0x13   :  { %1711 = vmatpush.msra.mxu3 %v270_v50  ;;  %360 = vmatpush.msrb.mxu2 %v1926_v18  ;;  %v126_v12 = vsub.f32 %v1994_v59, %v125_v6  ;;  %v191_v14 = vand.u32 4294901760, %v190_v8  ;;  %v197_v16 = vand.u32 4294901760, %v2021_v10  ;;  %v30_v18 = vld [vmem:[%s2823_s0 + $0x68] sm:$0xff]  ;;  %v2064_v29 = vsub.f32 %v52_v17, %v2048_v21 }
  0x14   :  { %305 = vmatmul.f32.vlgmr.msra.gmra.mxu3 %v1920_v15  ;;  %271 = vmatpush.msra.mxu1 %v270_v50  ;;  %v119_v2 = vand.u32 4294901760, %v118_v0  ;;  %v133_v20 = vand.u32 4294901760, %v2033_v13  ;;  %v2076_v40 = vand.u32 4294901760, %v55_v36  ;;  %v2095_v54 = vand.u32 4294901760, %v82_v45 }
  0x15   :  { %455 = vmatpush.msrb.mxu3 %v1893_v3  ;;  %273 = vmatmul.f32.vlgmr.msra.gmra.mxu1 %v1941_v28  ;;  %v198_v22 = vsub.f32 %v2021_v10, %v197_v16  ;;  %v141_v39 = vand.u32 4294901760, %v2064_v29  ;;  %v58_v56 = vsel %vm2836_vm0, %v23_v46, 0  ;;  %v85_v8 = vsel %vm2836_vm0, %v32_v57, 0 }
  0x16   :  { %665 = vmatpush.msrb.mxu1 %v1893_v3  ;;  %586 = vmatpush.msrb.mxu0 %v268_v26  ;;  %v76_v3 = vsel %vm2836_vm0, %v29_v1, 0  ;;  %v134_v26 = vsub.f32 %v2033_v13, %v133_v20  ;;  %v2092_v48 = vsub.f32 %v55_v36, %v2076_v40  ;;  %v2104_v0 = vand.u32 4294901760, %v58_v56 }
  0x17   :  { %184 = vmatmul.f32.gmra.mxu2 %v183_v60  ;;  %457 = vmatpush.msrb.mxu3 %v1895_v4  ;;  %v199_v31 = vand.u32 4294901760, %v198_v22  ;;  %v142_v47 = vsub.f32 %v2064_v29, %v141_v39  ;;  %vm2828_vm1 = vcmask 130048   ;;  %vm2835_vm2 = vcmask 1041409  }
  0x18   :  { %667 = vmatpush.msrb.mxu1 %v1895_v4  ;;  %v2037_v4 = vand.u32 4294901760, %v76_v3  ;;  %v135_v38 = vand.u32 4294901760, %v134_v26  ;;  %v149_v63 = vand.u32 4294901760, %v2092_v48  ;;  %vm2834_vm3 = vcmask 1042434  }
  0x19   :  { %459 = vmatpush.msrb.mxu3 %v1897_v5  ;;  %v143_v60 = vand.u32 4294901760, %v142_v47  ;;  %vm2833_vm4 = vcmask 1043459   ;;  %vm2832_vm5 = vcmask 1044484   ;;  %vm2831_vm6 = vcmask 1045509  }
  0x1a   :  { %120 = vmatmul.f32.gmra.mxu0 %v119_v2  ;;  %669 = vmatpush.msrb.mxu1 %v1897_v5  ;;  %v127_v5 = vand.u32 4294901760, %v126_v12  ;;  %v2054_v24 = vsub.f32 %v76_v3, %v2037_v4  ;;  %v2110_v2 = vsub.f32 %v82_v45, %v2095_v54  ;;  %v24_v3 = vld [vmem:[%s2823_s0 + $0x38] sm:$0xff]  ;;  %v150_v11 = vsub.f32 %v2092_v48, %v149_v63 }
  0x1b   :  { %461 = vmatpush.msrb.mxu3 %v1908_v9  ;;  %v156_v12 = vsub.f32 %v58_v56, %v2104_v0  ;;  %vm2830_vm7 = vcmask 1046534   ;;  %vm2829_vm8 = vcmask 1047559   ;;  %vm878_vm9 = vcmask 64512  }
  0x1c   :  { %309 = vmatmul.f32.gmra.mxu3 %v1928_v19  ;;  %671 = vmatpush.msrb.mxu1 %v1908_v9  ;;  %v79_v9 = vsel %vm2836_vm0, %v30_v18, 0  ;;  %v205_v32 = vand.u32 4294901760, %v2054_v24  ;;  %v221_v17 = vand.u32 4294901760, %v2110_v2  ;;  %v2121_v18 = vand.u32 4294901760, %v85_v8 }
  0x1d   :  { %277 = vmatmul.f32.gmra.mxu1 %v1975_v49  ;;  %v2067_v33 = vand.u32 4294901760, %v79_v9  ;;  %v151_v22 = vand.u32 4294901760, %v150_v11 }
  0x1e   :  { %v206_v43 = vsub.f32 %v2054_v24, %v205_v32  ;;  %v222_v26 = vsub.f32 %v2110_v2, %v221_v17 }
  0x1f   :  { %192 = vmatmul.f32.gmra.mxu2 %v191_v14  ;;  %v2082_v44 = vsub.f32 %v79_v9, %v2067_v33  ;;  %v157_v9 = vand.u32 4294901760, %v156_v12 }
  0x20   :  { %v207_v50 = vand.u32 4294901760, %v206_v43 }
  0x21   :  { %v213_v51 = vand.u32 4294901760, %v2082_v44  ;;  %v158_v36 = vsub.f32 %v156_v12, %v157_v9 }
  0x22   :  { %128 = vmatmul.f32.gmra.mxu0 %v127_v5  ;;  %v61_v5 = vsel %vm2836_vm0, %v24_v3, 0 }
  0x23   :  { %v214_v1 = vsub.f32 %v2082_v44, %v213_v51  ;;  %v163_v25 = vand.u32 4294901760, %v61_v5  ;;  %v159_v45 = vand.u32 4294901760, %v158_v36 }
  0x24   :  { %313 = vmatmul.f32.gmra.mxu3 %v1952_v35 }
  0x25   :  { %281 = vmatmul.f32.gmra.mxu1 %v1983_v53  ;;  %v215_v14 = vand.u32 4294901760, %v214_v1  ;;  %v164_v37 = vsub.f32 %v61_v5, %v163_v25 }
  0x27   :  { %200 = vmatmul.f32.gmra.mxu2 %v199_v31  ;;  %v2130_v31 = vsub.f32 %v85_v8, %v2121_v18  ;;  %v165_v46 = vand.u32 4294901760, %v164_v37 }
  0x29   :  { %v229_v43 = vand.u32 4294901760, %v2130_v31 }
  0x2a   :  { %136 = vmatmul.f32.gmra.mxu0 %v135_v38  ;;  %v223_v38 = vand.u32 4294901760, %v222_v26 }
  0x2b   :  { %v230_v47 = vsub.f32 %v2130_v31, %v229_v43 }
  0x2c   :  { %317 = vmatmul.f32.gmra.mxu3 %v1997_v62 }
  0x2d   :  { %285 = vmatmul.f32.gmra.mxu1 %v2012_v7  ;;  %v231_v56 = vand.u32 4294901760, %v230_v47 }
  0x2f   :  { %208 = vmatmul.f32.gmra.mxu2 %v207_v50  ;;  %v166_v50 = vsub.f32 %v164_v37, %v165_v46 }
  0x31   :  { %v167_v57 = vand.u32 4294901760, %v166_v50 }
  0x32   :  { %144 = vmatmul.f32.gmra.mxu0 %v143_v60 }
  0x34   :  { %321 = vmatmul.f32.gmra.mxu3 %v2037_v4 }
  0x35   :  { %289 = vmatmul.f32.gmra.mxu1 %v2048_v21 }
  0x37   :  { %216 = vmatmul.f32.gmra.mxu2 %v215_v14 }
  0x3a   :  { %152 = vmatmul.f32.gmra.mxu0 %v151_v22 }
  0x3c   :  { %325 = vmatmul.f32.gmra.mxu3 %v2067_v33 }
  0x3d   :  { %293 = vmatmul.f32.gmra.mxu1 %v2076_v40 }
  0x3f   :  { %224 = vmatmul.f32.gmra.mxu2 %v223_v38 }
  0x42   :  { %160 = vmatmul.f32.gmra.mxu0 %v159_v45 }
  0x44   :  { %329 = vmatmul.f32.gmra.mxu3 %v2095_v54 }
  0x45   :  { %297 = vmatmul.f32.gmra.mxu1 %v2104_v0 }
  0x47   :  { %232 = vmatmul.f32.gmra.mxu2 %v231_v56 }
  0x4a   :  { %168 = vmatmul.f32.gmra.mxu0 %v167_v57 }
  0x4c   :  { %333 = vmatmul.f32.gmra.mxu3 %v2121_v18 }
  0x4d   :  { %301 = vmatmul.f32.gmra.mxu1 %v163_v25 }
  0x4f   :  { %363 = vmatmul.f32.vlgmr.msrb.gmra.mxu2 %v1950_v34 }
  0x52   :  { %588 = vmatmul.f32.vlgmr.msrb.gmra.mxu0 %v1941_v28 }
  0x54   :  { %465 = vmatmul.f32.vlgmr.msrb.gmra.mxu3 %v109_v42 }
  0x55   :  { %673 = vmatmul.f32.vlgmr.msrb.gmra.mxu1 %v1941_v28 }
  0x57   :  { %368 = vmatmul.f32.gmra.mxu2 %v1986_v55 }
  0x5a   :  { %592 = vmatmul.f32.gmra.mxu0 %v1975_v49 }
  0x5c   :  { %471 = vmatmul.f32.gmra.mxu3 %v117_v58 }
  0x5d   :  { %677 = vmatmul.f32.gmra.mxu1 %v1975_v49 }
  0x5f   :  { %373 = vmatmul.f32.gmra.mxu2 %v1994_v59 }
  0x62   :  { %596 = vmatmul.f32.gmra.mxu0 %v1983_v53 }
  0x64   :  { %477 = vmatmul.f32.gmra.mxu3 %v125_v6 }
  0x65   :  { %681 = vmatmul.f32.gmra.mxu1 %v1983_v53 }
  0x67   :  { %378 = vmatmul.f32.gmra.mxu2 %v2033_v13 }
  0x6a   :  { %600 = vmatmul.f32.gmra.mxu0 %v2012_v7 }
  0x6c   :  { %483 = vmatmul.f32.gmra.mxu3 %v133_v20 }
  0x6d   :  { %685 = vmatmul.f32.gmra.mxu1 %v2012_v7 }
  0x6f   :  { %383 = vmatmul.f32.gmra.mxu2 %v2064_v29 }
  0x72   :  { %604 = vmatmul.f32.gmra.mxu0 %v2048_v21 }
  0x74   :  { %489 = vmatmul.f32.gmra.mxu3 %v141_v39 }
  0x75   :  { %689 = vmatmul.f32.gmra.mxu1 %v2048_v21 }
  0x77   :  { %388 = vmatmul.f32.gmra.mxu2 %v2092_v48 }
  0x7a   :  { %608 = vmatmul.f32.gmra.mxu0 %v2076_v40 }
  0x7c   :  { %495 = vmatmul.f32.gmra.mxu3 %v149_v63 }
  0x7d   :  { %693 = vmatmul.f32.gmra.mxu1 %v2076_v40 }
  0x7f   :  { %393 = vmatmul.f32.gmra.mxu2 %v156_v12 }
  0x82   :  { %612 = vmatmul.f32.gmra.mxu0 %v2104_v0 }
  0x84   :  { %501 = vmatmul.f32.gmra.mxu3 %v157_v9 }
  0x85   :  { %697 = vmatmul.f32.gmra.mxu1 %v2104_v0 }
  0x87   :  { %398 = vmatmul.f32.gmra.mxu2 %v164_v37 }
  0x8a   :  { %616 = vmatmul.f32.gmra.mxu0 %v163_v25 }
  0x8c   :  { %507 = vmatmul.f32.gmra.mxu3 %v165_v46 }
  0x8d   :  { %701 = vmatmul.f32.gmra.mxu1 %v163_v25 }
  0x8f   :  { %403 = vmatmul.f32.gmra.mxu2 %v1934_v23  ;;  %v2174_v28 = vpop.f32.mrf.mxu0 }
  0x92   :  { %v177_v34 = vpop.f32.mrf.mxu2  ;;  %v2176_v42 = vpop.f32.mrf.mxu1  ;;  %620 = vmatmul.f32.gmra.mxu0 %v1920_v15 }
  0x93   :  { %v275_v11 = vadd.f32 %v2176_v42, %v2174_v28 }
  0x94   :  { %513 = vmatmul.f32.gmra.mxu3 %v173_v30 }
  0x95   :  { %705 = vmatmul.f32.gmra.mxu1 %v1920_v15 }
  0x97   :  { %408 = vmatmul.f32.gmra.mxu2 %v1939_v27  ;;  %v306_v49 = vpop.f32.mrf.mxu3  ;;  %v2183_v53 = vpop.f32.mrf.mxu0 }
  0x98   :  { %v2185_v55 = vadd.f32 %v306_v49, %v177_v34 }
  0x9a   :  { %v185_v58 = vpop.f32.mrf.mxu2  ;;  %v2187_v59 = vpop.f32.mrf.mxu1  ;;  %624 = vmatmul.f32.gmra.mxu0 %v1928_v19 }
  0x9b   :  { %v279_v26 = vadd.f32 %v2187_v59, %v2183_v53 }
  0x9c   :  { %519 = vmatmul.f32.gmra.mxu3 %v181_v41 }
  0x9d   :  { %709 = vmatmul.f32.gmra.mxu1 %v1928_v19 }
  0x9f   :  { %413 = vmatmul.f32.gmra.mxu2 %v1981_v52  ;;  %v310_v15 = vpop.f32.mrf.mxu3  ;;  %v2194_v23 = vpop.f32.mrf.mxu0 }
  0xa0   :  { %v2196_v30 = vadd.f32 %v310_v15, %v185_v58 }
  0xa2   :  { %v193_v6 = vpop.f32.mrf.mxu2  ;;  %v2198_v7 = vpop.f32.mrf.mxu1  ;;  %628 = vmatmul.f32.gmra.mxu0 %v1952_v35 }
  0xa3   :  { %v283_v56 = vadd.f32 %v2198_v7, %v2194_v23 }
  0xa4   :  { %525 = vmatmul.f32.gmra.mxu3 %v189_v61 }
  0xa5   :  { %713 = vmatmul.f32.gmra.mxu1 %v1952_v35 }
  0xa7   :  { %418 = vmatmul.f32.gmra.mxu2 %v2021_v10  ;;  %v314_v19 = vpop.f32.mrf.mxu3  ;;  %v2205_v27 = vpop.f32.mrf.mxu0 }
  0xa8   :  { %v2207_v41 = vadd.f32 %v314_v19, %v193_v6 }
  0xaa   :  { %v201_v13 = vpop.f32.mrf.mxu2  ;;  %v2209_v20 = vpop.f32.mrf.mxu1  ;;  %632 = vmatmul.f32.gmra.mxu0 %v1997_v62 }
  0xac   :  { %531 = vmatmul.f32.gmra.mxu3 %v197_v16 }
  0xad   :  { %717 = vmatmul.f32.gmra.mxu1 %v1997_v62 }
  0xaf   :  { %423 = vmatmul.f32.gmra.mxu2 %v2054_v24  ;;  %v318_v35 = vpop.f32.mrf.mxu3  ;;  %v2216_v52 = vpop.f32.mrf.mxu0 }
  0xb0   :  { %v2218_v61 = vadd.f32 %v318_v35, %v201_v13  ;;  %v287_v13 = vadd.f32 %v2209_v20, %v2205_v27 }
  0xb2   :  { %v209_v21 = vpop.f32.mrf.mxu2  ;;  %v2220_v29 = vpop.f32.mrf.mxu1  ;;  %636 = vmatmul.f32.gmra.mxu0 %v2037_v4 }
  0xb4   :  { %537 = vmatmul.f32.gmra.mxu3 %v205_v32 }
  0xb5   :  { %721 = vmatmul.f32.gmra.mxu1 %v2037_v4 }
  0xb7   :  { %428 = vmatmul.f32.gmra.mxu2 %v2082_v44  ;;  %v322_v62 = vpop.f32.mrf.mxu3  ;;  %v2227_v10 = vpop.f32.mrf.mxu0 }
  0xb8   :  { %v2229_v16 = vadd.f32 %v322_v62, %v209_v21 }
  0xba   :  { %v217_v39 = vpop.f32.mrf.mxu2  ;;  %v2231_v40 = vpop.f32.mrf.mxu1  ;;  %640 = vmatmul.f32.gmra.mxu0 %v2067_v33 }
  0xbc   :  { %543 = vmatmul.f32.gmra.mxu3 %v213_v51 }
  0xbd   :  { %725 = vmatmul.f32.gmra.mxu1 %v2067_v33 }
  0xbf   :  { %433 = vmatmul.f32.gmra.mxu2 %v2110_v2  ;;  %v326_v4 = vpop.f32.mrf.mxu3  ;;  %v2238_v24 = vpop.f32.mrf.mxu0 }
  0xc0   :  { %v2240_v32 = vadd.f32 %v326_v4, %v217_v39 }
  0xc2   :  { %v225_v48 = vpop.f32.mrf.mxu2  ;;  %v2242_v60 = vpop.f32.mrf.mxu1  ;;  %644 = vmatmul.f32.gmra.mxu0 %v2095_v54 }
  0xc4   :  { %549 = vmatmul.f32.gmra.mxu3 %v221_v17 }
  0xc5   :  { %729 = vmatmul.f32.gmra.mxu1 %v2095_v54 }
  0xc7   :  { %438 = vmatmul.f32.gmra.mxu2 %v2130_v31  ;;  %v330_v33 = vpop.f32.mrf.mxu3  ;;  %v2249_v44 = vpop.f32.mrf.mxu0 }
  0xc8   :  { %v2251_v51 = vadd.f32 %v330_v33, %v225_v48 }
  0xca   :  { %v233_v63 = vpop.f32.mrf.mxu2  ;;  %v2253_v0 = vpop.f32.mrf.mxu1  ;;  %648 = vmatmul.f32.gmra.mxu0 %v2121_v18 }
  0xcc   :  { %555 = vmatmul.f32.gmra.mxu3 %v229_v43  ;;  %v2268_v43 = vld [vmem:[%s2825_s2] ss:$0 sm:$0xff] }
  0xcd   :  { %733 = vmatmul.f32.gmra.mxu1 %v2121_v18 }
  0xcf   :  { %v334_v1 = vpop.f32.mrf.mxu3  ;;  %v589_v2 = vpop.f32.mrf.mxu0 }
  0xd0   :  { %v2259_v54 = vadd.f32 %v334_v1, %v233_v63 }
  0xd2   :  { %v364_v8 = vpop.f32.mrf.mxu2  ;;  %v674_v3 = vpop.f32.mrf.mxu1 }
  0xd3   :  { %v365_v12 = vadd.f32 %v364_v8, %v275_v11 }
  0xd7   :  { %v466_v14 = vpop.f32.mrf.mxu3  ;;  %v593_v17 = vpop.f32.mrf.mxu0 }
  0xd8   :  { %v467_v5 = vadd.f32 %v466_v14, %v365_v12 }
  0xda   :  { %v369_v22 = vpop.f32.mrf.mxu2  ;;  %v590_v9 = vadd.f32 %v589_v2, %v467_v5  ;;  %v678_v25 = vpop.f32.mrf.mxu1  ;;  %v291_v2 = vadd.f32 %v2220_v29, %v2216_v52 }
  0xdb   :  { %v370_v31 = vadd.f32 %v369_v22, %v279_v26 }
  0xdc   :  { %v675_v18 = vadd.f32 %v674_v3, %v590_v9 }
  0xde   :  { %1719 = vtanh.f32 %v675_v18 }
  0xdf   :  { %v472_v36 = vpop.f32.mrf.mxu3  ;;  %v597_v37 = vpop.f32.mrf.mxu0 }
  0xe0   :  { %v473_v38 = vadd.f32 %v472_v36, %v370_v31 }
  0xe2   :  { %v374_v45 = vpop.f32.mrf.mxu2  ;;  %v594_v46 = vadd.f32 %v593_v17, %v473_v38  ;;  %v682_v47 = vpop.f32.mrf.mxu1 }
  0xe3   :  { %v375_v34 = vadd.f32 %v374_v45, %v283_v56 }
  0xe4   :  { %v1720_v50 = vpop.eup %1719  ;;  %v679_v57 = vadd.f32 %v678_v25, %v594_v46  ;;  %v295_v25 = vadd.f32 %v2231_v40, %v2227_v10 }
  0xe5   :  { %v756_v28 = vmul.f32 %v1720_v50, %v2268_v43  ;;  %v299_v50 = vadd.f32 %v2242_v60, %v2238_v24 }
  0xe6   :  { %1721 = vtanh.f32 %v679_v57 }
  0xe7   :  { %v478_v42 = vpop.f32.mrf.mxu3  ;;  %v773_v49 = vsel %vm2828_vm1, %v756_v28, 0.0  ;;  %v601_v53 = vpop.f32.mrf.mxu0 }
  0xe8   :  { %v479_v58 = vadd.f32 %v478_v42, %v375_v34  ;;  %774 = vadd.xlane.f32.xlu0 %v773_v49 }
  0xea   :  { %v379_v59 = vpop.f32.mrf.mxu2  ;;  %v598_v15 = vadd.f32 %v597_v37, %v479_v58  ;;  %v686_v6 = vpop.f32.mrf.mxu1 }
  0xeb   :  { %v380_v35 = vadd.f32 %v379_v59, %v287_v13 }
  0xec   :  { %v1722_v19 = vpop.eup %1721  ;;  %v683_v23 = vadd.f32 %v682_v47, %v598_v15  ;;  %v303_v15 = vadd.f32 %v2253_v0, %v2249_v44 }
  0xed   :  { %v757_v7 = vmul.f32 %v1722_v19, %v2268_v43 }
  0xee   :  { %1723 = vtanh.f32 %v683_v23 }
  0xef   :  { %v484_v21 = vpop.f32.mrf.mxu3  ;;  %v776_v62 = vsel %vm2828_vm1, %v757_v7, 0.0  ;;  %v605_v39 = vpop.f32.mrf.mxu0 }
  0xf0   :  { %v485_v4 = vadd.f32 %v484_v21, %v380_v35  ;;  %777 = vadd.xlane.f32.xlu0 %v776_v62 }
  0xf2   :  { %v384_v48 = vpop.f32.mrf.mxu2  ;;  %v602_v33 = vadd.f32 %v601_v53, %v485_v4  ;;  %v690_v63 = vpop.f32.mrf.mxu1 }
  0xf3   :  { %v385_v20 = vadd.f32 %v384_v48, %v291_v2 }
  0xf4   :  { %v1724_v1 = vpop.eup %1723  ;;  %v687_v8 = vadd.f32 %v686_v6, %v602_v33 }
  0xf5   :  { %v758_v27 = vmul.f32 %v1724_v1, %v2268_v43 }
  0xf6   :  { %1725 = vtanh.f32 %v687_v8 }
  0xf7   :  { %v490_v3 = vpop.f32.mrf.mxu3  ;;  %v779_v11 = vsel %vm2828_vm1, %v758_v27, 0.0  ;;  %v609_v12 = vpop.f32.mrf.mxu0 }
  0xf8   :  { %v491_v14 = vadd.f32 %v490_v3, %v385_v20  ;;  %780 = vadd.xlane.f32.xlu1 %v779_v11 }
  0xfa   :  { %v389_v17 = vpop.f32.mrf.mxu2  ;;  %v606_v5 = vadd.f32 %v605_v39, %v491_v14  ;;  %v694_v22 = vpop.f32.mrf.mxu1 }
  0xfb   :  { %v390_v29 = vadd.f32 %v389_v17, %v295_v25 }
  0xfc   :  { %v1726_v9 = vpop.eup %1725  ;;  %v691_v26 = vadd.f32 %v690_v63, %v606_v5 }
  0xfd   :  { %v759_v52 = vmul.f32 %v1726_v9, %v2268_v43 }
  0xfe   :  { %1727 = vtanh.f32 %v691_v26 }
  0xff   :  { %v496_v18 = vpop.f32.mrf.mxu3  ;;  %v782_v31 = vsel %vm2828_vm1, %v759_v52, 0.0  ;;  %v613_v36 = vpop.f32.mrf.mxu0 }
 0x100   :  { %v497_v37 = vadd.f32 %v496_v18, %v390_v29  ;;  %783 = vadd.xlane.f32.xlu1 %v782_v31 }
 0x102   :  { %v394_v38 = vpop.f32.mrf.mxu2  ;;  %v610_v45 = vadd.f32 %v609_v12, %v497_v37  ;;  %v698_v46 = vpop.f32.mrf.mxu1 }
 0x103   :  { %v395_v40 = vadd.f32 %v394_v38, %v299_v50 }
 0x104   :  { %v1728_v47 = vpop.eup %1727  ;;  %v695_v56 = vadd.f32 %v694_v22, %v610_v45 }
 0x105   :  { %v760_v10 = vmul.f32 %v1728_v47, %v2268_v43 }
 0x106   :  { %1729 = vtanh.f32 %v695_v56 }
 0x107   :  { %v502_v57 = vpop.f32.mrf.mxu3  ;;  %v785_v28 = vsel %vm2828_vm1, %v760_v10, 0.0  ;;  %v617_v34 = vpop.f32.mrf.mxu0 }
 0x108   :  { %v503_v42 = vadd.f32 %v502_v57, %v395_v40  ;;  %786 = vadd.xlane.f32.xlu2 %v785_v28 }
 0x10a   :  { %v399_v49 = vpop.f32.mrf.mxu2  ;;  %v614_v53 = vadd.f32 %v613_v36, %v503_v42  ;;  %v702_v58 = vpop.f32.mrf.mxu1 }
 0x10b   :  { %v400_v60 = vadd.f32 %v399_v49, %v303_v15 }
 0x10c   :  { %v1730_v59 = vpop.eup %1729  ;;  %v699_v6 = vadd.f32 %v698_v46, %v614_v53 }
 0x10d   :  { %v761_v24 = vmul.f32 %v1730_v59, %v2268_v43 }
 0x10e   :  { %1731 = vtanh.f32 %v699_v6 }
 0x10f   :  { %v508_v19 = vpop.f32.mrf.mxu3  ;;  %v788_v13 = vsel %vm2828_vm1, %v761_v24, 0.0  ;;  %v621_v23 = vpop.f32.mrf.mxu0 }
 0x110   :  { %v509_v7 = vadd.f32 %v508_v19, %v400_v60  ;;  %789 = vadd.xlane.f32.xlu1 %v788_v13 }
 0x112   :  { %v404_v35 = vpop.f32.mrf.mxu2  ;;  %v618_v21 = vadd.f32 %v617_v34, %v509_v7  ;;  %v706_v62 = vpop.f32.mrf.mxu1 }
 0x113   :  { %v405_v44 = vadd.f32 %v404_v35, %v2185_v55 }
 0x114   :  { %v1732_v39 = vpop.eup %1731  ;;  %v703_v4 = vadd.f32 %v702_v58, %v618_v21 }
 0x115   :  { %v762_v48 = vmul.f32 %v1732_v39, %v2268_v43 }
 0x116   :  { %1733 = vtanh.f32 %v703_v4 }
 0x117   :  { %v514_v0 = vpop.f32.mrf.mxu3  ;;  %v791_v33 = vsel %vm2828_vm1, %v762_v48, 0.0  ;;  %v625_v63 = vpop.f32.mrf.mxu0 }
 0x118   :  { %v515_v1 = vadd.f32 %v514_v0, %v405_v44  ;;  %792 = vadd.xlane.f32.xlu0 %v791_v33 }
 0x11a   :  { %v409_v2 = vpop.f32.mrf.mxu2  ;;  %v622_v8 = vadd.f32 %v621_v23, %v515_v1  ;;  %v710_v27 = vpop.f32.mrf.mxu1 }
 0x11b   :  { %v410_v12 = vadd.f32 %v409_v2, %v2196_v30 }
 0x11c   :  { %v1734_v20 = vpop.eup %1733  ;;  %v707_v3 = vadd.f32 %v706_v62, %v622_v8 }
 0x11d   :  { %v763_v11 = vmul.f32 %v1734_v20, %v2268_v43 }
 0x11e   :  { %1735 = vtanh.f32 %v707_v3 }
 0x11f   :  { %v520_v14 = vpop.f32.mrf.mxu3  ;;  %v794_v55 = vsel %vm2828_vm1, %v763_v11, 0.0  ;;  %v629_v17 = vpop.f32.mrf.mxu0 }
 0x120   :  { %v521_v5 = vadd.f32 %v520_v14, %v410_v12  ;;  %795 = vadd.xlane.f32.xlu2 %v794_v55 }
 0x122   :  { %v414_v22 = vpop.f32.mrf.mxu2  ;;  %v626_v9 = vadd.f32 %v625_v63, %v521_v5  ;;  %v714_v25 = vpop.f32.mrf.mxu1 }
 0x123   :  { %v415_v18 = vadd.f32 %v414_v22, %v2207_v41 }
 0x124   :  { %v1736_v26 = vpop.eup %1735  ;;  %v711_v52 = vadd.f32 %v710_v27, %v626_v9 }
 0x125   :  { %v764_v29 = vmul.f32 %v1736_v26, %v2268_v43 }
 0x126   :  { %1737 = vtanh.f32 %v711_v52 }
 0x127   :  { %v526_v31 = vpop.f32.mrf.mxu3  ;;  %v797_v30 = vsel %vm2828_vm1, %v764_v29, 0.0  ;;  %v633_v36 = vpop.f32.mrf.mxu0 }
 0x128   :  { %v527_v37 = vadd.f32 %v526_v31, %v415_v18  ;;  %798 = vadd.xlane.f32.xlu2 %v797_v30 }
 0x12a   :  { %v419_v38 = vpop.f32.mrf.mxu2  ;;  %v630_v45 = vadd.f32 %v629_v17, %v527_v37  ;;  %v718_v46 = vpop.f32.mrf.mxu1 }
 0x12b   :  { %v420_v10 = vadd.f32 %v419_v38, %v2218_v61 }
 0x12c   :  { %v1738_v47 = vpop.eup %1737  ;;  %v715_v50 = vadd.f32 %v714_v25, %v630_v45 }
 0x12d   :  { %v765_v56 = vmul.f32 %v1738_v47, %v2268_v43 }
 0x12e   :  { %1739 = vtanh.f32 %v715_v50 }
 0x12f   :  { %v532_v40 = vpop.f32.mrf.mxu3  ;;  %v800_v41 = vsel %vm2828_vm1, %v765_v56, 0.0  ;;  %v637_v28 = vpop.f32.mrf.mxu0 }
 0x130   :  { %v533_v57 = vadd.f32 %v532_v40, %v420_v10  ;;  %801 = vadd.xlane.f32.xlu0 %v800_v41 }
 0x132   :  { %v424_v34 = vpop.f32.mrf.mxu2  ;;  %v634_v42 = vadd.f32 %v633_v36, %v533_v57  ;;  %v722_v49 = vpop.f32.mrf.mxu1 }
 0x133   :  { %v425_v15 = vadd.f32 %v424_v34, %v2229_v16 }
 0x134   :  { %v1740_v53 = vpop.eup %1739  ;;  %v719_v58 = vadd.f32 %v718_v46, %v634_v42  ;;  %v837_v46 = vlaneseq }
 0x135   :  { %v766_v59 = vmul.f32 %v1740_v53, %v2268_v43 }
 0x136   :  { %1741 = vtanh.f32 %v719_v58  ;;  %v2330_v50 = vand.u32 127, %v837_v46 }
 0x137   :  { %v538_v6 = vpop.f32.mrf.mxu3  ;;  %v803_v61 = vsel %vm2828_vm1, %v766_v59, 0.0  ;;  %v641_v13 = vpop.f32.mrf.mxu0 }
 0x138   :  { %v539_v24 = vadd.f32 %v538_v6, %v425_v15  ;;  %804 = vadd.xlane.f32.xlu2 %v803_v61 }
 0x13a   :  { %v429_v60 = vpop.f32.mrf.mxu2  ;;  %v638_v19 = vadd.f32 %v637_v28, %v539_v24  ;;  %v726_v21 = vpop.f32.mrf.mxu1 }
 0x13b   :  { %v430_v62 = vadd.f32 %v429_v60, %v2240_v32 }
 0x13c   :  { %v1742_v23 = vpop.eup %1741  ;;  %v723_v7 = vadd.f32 %v722_v49, %v638_v19 }
 0x13d   :  { %v767_v35 = vmul.f32 %v1742_v23, %v2268_v43 }
 0x13e   :  { %1743 = vtanh.f32 %v723_v7 }
 0x13f   :  { %v544_v39 = vpop.f32.mrf.mxu3  ;;  %v806_v16 = vsel %vm2828_vm1, %v767_v35, 0.0  ;;  %v645_v1 = vpop.f32.mrf.mxu0 }
 0x140   :  { %v545_v4 = vadd.f32 %v544_v39, %v430_v62  ;;  %807 = vadd.xlane.f32.xlu1 %v806_v16 }
 0x142   :  { %v434_v48 = vpop.f32.mrf.mxu2  ;;  %v642_v44 = vadd.f32 %v641_v13, %v545_v4  ;;  %v730_v32 = vpop.f32.mrf.mxu1 }
 0x143   :  { %v435_v2 = vadd.f32 %v434_v48, %v2251_v51 }
 0x144   :  { %v1744_v0 = vpop.eup %1743  ;;  %v727_v33 = vadd.f32 %v726_v21, %v642_v44 }
 0x145   :  { %v768_v63 = vmul.f32 %v1744_v0, %v2268_v43 }
 0x146   :  { %1745 = vtanh.f32 %v727_v33 }
 0x147   :  { %v550_v8 = vpop.f32.mrf.mxu3  ;;  %v809_v27 = vsel %vm2828_vm1, %v768_v63, 0.0  ;;  %v649_v51 = vpop.f32.mrf.mxu0 }
 0x148   :  { %v551_v20 = vadd.f32 %v550_v8, %v435_v2  ;;  %810 = vadd.xlane.f32.xlu0 %v809_v27 }
 0x14a   :  { %v646_v3 = vadd.f32 %v645_v1, %v551_v20  ;;  %v439_v11 = vpop.f32.mrf.mxu2  ;;  %v734_v25 = vpop.f32.mrf.mxu1 }
 0x14b   :  { %v440_v17 = vadd.f32 %v439_v11, %v2259_v54 }
 0x14c   :  { %v1746_v12 = vpop.eup %1745  ;;  %v731_v14 = vadd.f32 %v730_v32, %v646_v3 }
 0x14d   :  { %v769_v55 = vmul.f32 %v1746_v12, %v2268_v43 }
 0x14e   :  { %1747 = vtanh.f32 %v731_v14 }
 0x14f   :  { %v556_v5 = vpop.f32.mrf.mxu3  ;;  %v812_v22 = vsel %vm2828_vm1, %v769_v55, 0.0 }
 0x150   :  { %v557_v9 = vadd.f32 %v556_v5, %v440_v17  ;;  %813 = vadd.xlane.f32.xlu1 %v812_v22  ;;  %v1857_v17 = vmov 0  }
 0x151   :  { %1717 = vset.pattern.permute.xlu2 %v1857_v17  ;;  %1716 = vset.pattern.permute.xlu1 %v1857_v17 }
 0x152   :  { %v650_v26 = vadd.f32 %v649_v51, %v557_v9  ;;  %1715 = vset.pattern.permute.xlu0 %v1857_v17 }
 0x154   :  { %v1748_v52 = vpop.eup %1747  ;;  %v735_v29 = vadd.f32 %v734_v25, %v650_v26 }
 0x155   :  { %v770_v18 = vmul.f32 %v1748_v52, %v2268_v43 }
 0x156   :  { %1749 = vtanh.f32 %v735_v29 }
 0x157   :  { %v815_v31 = vsel %vm2828_vm1, %v770_v18, 0.0 }
 0x158   :  { %816 = vadd.xlane.f32.xlu2 %v815_v31 }
 0x15b   :  { %v2324_v38 = vpop.xlane.xlu0 %774 }
 0x15c   :  { %v1750_v30 = vpop.eup %1749  ;;  %v839_v41 = vperm.slane %v2324_v38, %v2330_v50 }
 0x15d   :  { %v771_v54 = vmul.f32 %v1750_v30, %v2268_v43 }
 0x15f   :  { %v818_v36 = vsel %vm2828_vm1, %v771_v54, 0.0 }
 0x160   :  { %819 = vadd.xlane.f32.xlu0 %v818_v36 }
 0x163   :  { %v2328_v47 = vpop.xlane.xlu0 %777 }
 0x164   :  { %v840_v10 = vperm.slane %v2328_v47, %v2330_v50 }
 0x166   :  { %v856_v42 = vsel %vm2835_vm2, %v840_v10, %v839_v41 }
 0x16b   :  { %v2322_v37 = vpop.xlane.xlu1 %780 }
 0x16c   :  { %v841_v43 = vperm.slane %v2322_v37, %v2330_v50 }
 0x16e   :  { %v858_v53 = vsel %vm2834_vm3, %v841_v43, %v856_v42 }
 0x173   :  { %v2326_v45 = vpop.xlane.xlu1 %783 }
 0x174   :  { %v842_v57 = vperm.slane %v2326_v45, %v2330_v50 }
 0x176   :  { %v860_v59 = vsel %vm2833_vm4, %v842_v57, %v858_v53 }
 0x17b   :  { %v2332_v56 = vpop.xlane.xlu2 %786 }
 0x17c   :  { %v843_v34 = vperm.slane %v2332_v56, %v2330_v50 }
 0x17e   :  { %v862_v15 = vsel %vm2832_vm5, %v843_v34, %v860_v59 }
 0x183   :  { %v2338_v40 = vpop.xlane.xlu1 %789 }
 0x184   :  { %v844_v49 = vperm.slane %v2338_v40, %v2330_v50 }
 0x186   :  { %v864_v24 = vsel %vm2831_vm6, %v844_v49, %v862_v15 }
 0x18b   :  { %v2344_v28 = vpop.xlane.xlu0 %792 }
 0x18c   :  { %v845_v58 = vperm.slane %v2344_v28, %v2330_v50 }
 0x18e   :  { %v866_v60 = vsel %vm2830_vm7, %v845_v58, %v864_v24 }
 0x193   :  { %v796_v6 = vpop.xlane.xlu2 %795 }
 0x194   :  { %v846_v61 = vperm.slane %v796_v6, %v2330_v50 }
 0x196   :  { %v868_v19 = vsel %vm2829_vm8, %v846_v61, %v866_v60 }
 0x197   :  { %v879_v13 = vsel %vm878_vm9, %v868_v19, -inf }
 0x198   :  { %880 = vmax.xlane.f32.xlu1 %v879_v13 }
 0x19b   :  { %v2361_v23 = vpop.xlane.xlu2 %798 }
 0x19c   :  { %v847_v48 = vperm.slane %v2361_v23, %v2330_v50 }
 0x1a3   :  { %v2363_v7 = vpop.xlane.xlu0 %801 }
 0x1a4   :  { %v848_v39 = vperm.slane %v2363_v7, %v2330_v50 }
 0x1a6   :  { %v869_v63 = vsel %vm2835_vm2, %v848_v39, %v847_v48 }
 0x1ab   :  { %v2367_v21 = vpop.xlane.xlu2 %804 }
 0x1ac   :  { %v849_v16 = vperm.slane %v2367_v21, %v2330_v50 }
 0x1ae   :  { %v870_v2 = vsel %vm2834_vm3, %v849_v16, %v869_v63 }
 0x1b3   :  { %v2365_v35 = vpop.xlane.xlu1 %807 }
 0x1b4   :  { %v850_v44 = vperm.slane %v2365_v35, %v2330_v50 }
 0x1b6   :  { %v871_v27 = vsel %vm2833_vm4, %v850_v44, %v870_v2 }
 0x1bb   :  { %v2369_v62 = vpop.xlane.xlu0 %810 }
 0x1bc   :  { %v851_v33 = vperm.slane %v2369_v62, %v2330_v50 }
 0x1be   :  { %v872_v32 = vsel %vm2832_vm5, %v851_v33, %v871_v27 }
 0x1c3   :  { %v2375_v4 = vpop.xlane.xlu1 %813 }
 0x1c4   :  { %v852_v1 = vperm.slane %v2375_v4, %v2330_v50 }
 0x1c6   :  { %v873_v11 = vsel %vm2831_vm6, %v852_v1, %v872_v32 }
 0x1cb   :  { %v2381_v0 = vpop.xlane.xlu2 %816 }
 0x1cc   :  { %v853_v8 = vperm.slane %v2381_v0, %v2330_v50 }
 0x1ce   :  { %v874_v12 = vsel %vm2830_vm7, %v853_v8, %v873_v11 }
 0x1d3   :  { %v2393_v20 = vpop.xlane.xlu0 %819 }
 0x1d4   :  { %v854_v3 = vperm.slane %v2393_v20, %v2330_v50 }
 0x1d6   :  { %v875_v14 = vsel %vm2829_vm8, %v854_v3, %v874_v12 }
 0x1d7   :  { %v882_v55 = vsel %vm878_vm9, %v875_v14, -inf }
 0x1d8   :  { %883 = vmax.xlane.f32.xlu2 %v882_v55 }
 0x20b   :  { %v881_v5 = vpop.xlane.xlu1 %880 }
 0x20c   :  { %v888_v22 = vperm.slane %v881_v5, 1  ;;  %v887_v51 = vperm.slane %v881_v5, 0  ;;  %v889_v9 = vperm.slane %v881_v5, 2  ;;  %v891_v29 = vperm.slane %v881_v5, 4 }
 0x20d   :  { %v894_v18 = vperm.slane %v881_v5, 7  ;;  %v890_v31 = vperm.slane %v881_v5, 3  ;;  %v892_v34 = vperm.slane %v881_v5, 5 }
 0x20e   :  { %v920_v25 = vsub.f32 %v2328_v47, %v888_v22  ;;  %v919_v26 = vsub.f32 %v2324_v38, %v887_v51  ;;  %v921_v52 = vsub.f32 %v2322_v37, %v889_v9  ;;  %v923_v46 = vsub.f32 %v2332_v56, %v891_v29 }
 0x20f   :  { %v926_v10 = vsub.f32 %v796_v6, %v894_v18  ;;  %v922_v43 = vsub.f32 %v2326_v45, %v890_v31  ;;  %v893_v47 = vperm.slane %v881_v5, 6  ;;  %v924_v45 = vsub.f32 %v2338_v40, %v892_v34 }
 0x210   :  { %v937_v30 = vmul.f32 1.442695, %v920_v25  ;;  %v935_v54 = vmul.f32 1.442695, %v919_v26  ;;  %v939_v36 = vmul.f32 1.442695, %v921_v52 }
 0x211   :  { %v943_v41 = vmul.f32 1.442695, %v923_v46  ;;  %v949_v57 = vmul.f32 1.442695, %v926_v10  ;;  %v941_v37 = vmul.f32 1.442695, %v922_v43  ;;  %v925_v56 = vsub.f32 %v2344_v28, %v893_v47 }
 0x212   :  { %1751 = vpow2.f32 %v937_v30  ;;  %v945_v59 = vmul.f32 1.442695, %v924_v45 }
 0x213   :  { %1753 = vpow2.f32 %v935_v54  ;;  %v947_v53 = vmul.f32 1.442695, %v925_v56 }
 0x214   :  { %1755 = vpow2.f32 %v939_v36 }
 0x215   :  { %1757 = vpow2.f32 %v943_v41 }
 0x216   :  { %1759 = vpow2.f32 %v949_v57 }
 0x217   :  { %1761 = vpow2.f32 %v941_v37 }
 0x218   :  { %v2406_v38 = vpop.eup %1751  ;;  %1763 = vpow2.f32 %v947_v53 }
 0x219   :  { %v2408_v42 = vpop.eup %1753  ;;  %987 = vperm.xlu1 %1716, %v2406_v38   ;;  %1765 = vpow2.f32 %v945_v59 }
 0x21a   :  { %v2411_v49 = vpop.eup %1755  ;;  %984 = vperm.xlu0 %1715, %v2408_v42  }
 0x21b   :  { %990 = vperm.xlu2 %1717, %v2411_v49   ;;  %v2417_v58 = vpop.eup %1757 }
 0x21c   :  { %v2419_v15 = vpop.eup %1759 }
 0x21d   :  { %v2422_v6 = vpop.eup %1761 }
 0x21e   :  { %v2426_v28 = vpop.eup %1763 }
 0x21f   :  { %v2429_v40 = vpop.eup %1765 }
 0x221   :  { %996 = vperm.xlu1 %1716, %v2417_v58  }
 0x222   :  { %1005 = vperm.xlu0 %1715, %v2419_v15  }
 0x223   :  { %993 = vperm.xlu2 %1717, %v2422_v6  }
 0x229   :  { %1002 = vperm.xlu1 %1716, %v2426_v28  }
 0x22b   :  { %999 = vperm.xlu2 %1717, %v2429_v40  }
 0x24b   :  { %v884_v61 = vpop.xlane.xlu2 %883 }
 0x24c   :  { %v897_v24 = vperm.slane %v884_v61, 2  ;;  %v896_v60 = vperm.slane %v884_v61, 1  ;;  %v895_v19 = vperm.slane %v884_v61, 0  ;;  %v900_v48 = vperm.slane %v884_v61, 5 }
 0x24d   :  { %v899_v44 = vperm.slane %v884_v61, 4  ;;  %v898_v33 = vperm.slane %v884_v61, 3  ;;  %v901_v12 = vperm.slane %v884_v61, 6 }
 0x24e   :  { %v929_v13 = vsub.f32 %v2367_v21, %v897_v24  ;;  %v928_v39 = vsub.f32 %v2363_v7, %v896_v60  ;;  %v927_v16 = vsub.f32 %v2361_v23, %v895_v19  ;;  %v932_v8 = vsub.f32 %v2375_v4, %v900_v48 }
 0x24f   :  { %v931_v27 = vsub.f32 %v2369_v62, %v899_v44  ;;  %v930_v32 = vsub.f32 %v2365_v35, %v898_v33  ;;  %v902_v7 = vperm.slane %v884_v61, 7  ;;  %v933_v62 = vsub.f32 %v2381_v0, %v901_v12 }
 0x250   :  { %v955_v63 = vmul.f32 1.442695, %v929_v13  ;;  %v953_v1 = vmul.f32 1.442695, %v928_v39  ;;  %v951_v2 = vmul.f32 1.442695, %v927_v16 }
 0x251   :  { %v961_v21 = vmul.f32 1.442695, %v932_v8  ;;  %v959_v3 = vmul.f32 1.442695, %v931_v27  ;;  %v957_v23 = vmul.f32 1.442695, %v930_v32  ;;  %v934_v35 = vsub.f32 %v2393_v20, %v902_v7 }
 0x252   :  { %1767 = vpow2.f32 %v955_v63  ;;  %v963_v5 = vmul.f32 1.442695, %v933_v62 }
 0x253   :  { %1769 = vpow2.f32 %v953_v1  ;;  %v965_v4 = vmul.f32 1.442695, %v934_v35 }
 0x254   :  { %1771 = vpow2.f32 %v951_v2 }
 0x255   :  { %1773 = vpow2.f32 %v961_v21 }
 0x256   :  { %1775 = vpow2.f32 %v959_v3 }
 0x257   :  { %1777 = vpow2.f32 %v957_v23 }
 0x258   :  { %v2438_v11 = vpop.eup %1767  ;;  %1779 = vpow2.f32 %v965_v4 }
 0x259   :  { %v2440_v14 = vpop.eup %1769  ;;  %1014 = vperm.xlu0 %1715, %v2438_v11   ;;  %1781 = vpow2.f32 %v963_v5 }
 0x25a   :  { %v2443_v55 = vpop.eup %1771  ;;  %1011 = vperm.xlu1 %1716, %v2440_v14  }
 0x25b   :  { %1008 = vperm.xlu2 %1717, %v2443_v55   ;;  %v2449_v17 = vpop.eup %1773 }
 0x25c   :  { %v2451_v22 = vpop.eup %1775 }
 0x25d   :  { %v2454_v51 = vpop.eup %1777 }
 0x25e   :  { %v2458_v20 = vpop.eup %1779 }
 0x25f   :  { %v2460_v9 = vpop.eup %1781 }
 0x261   :  { %1023 = vperm.xlu0 %1715, %v2449_v17  }
 0x262   :  { %1020 = vperm.xlu1 %1716, %v2451_v22  }
 0x263   :  { %1017 = vperm.xlu2 %1717, %v2454_v51  }
 0x26a   :  { %1029 = vperm.xlu1 %1716, %v2458_v20  }
 0x26b   :  { %1026 = vperm.xlu2 %1717, %v2460_v9  }
 0x275   :  { %v991_v0 = vpop.permute.xlu2 %990 }
 0x276   :  { %v1033_v54 = vperm.slane %v991_v0, %v2330_v50 }
 0x27d   :  { %v994_v52 = vpop.permute.xlu2 %993 }
 0x27e   :  { %v1034_v10 = vperm.slane %v994_v52, %v2330_v50 }
 0x285   :  { %v1000_v43 = vpop.permute.xlu2 %999 }
 0x286   :  { %v1036_v37 = vperm.slane %v1000_v43, %v2330_v50 }
 0x28b   :  { %v988_v25 = vpop.permute.xlu1 %987 }
 0x28c   :  { %v985_v26 = vpop.permute.xlu0 %984  ;;  %v1032_v29 = vperm.slane %v988_v25, %v2330_v50 }
 0x28d   :  { %v1031_v18 = vperm.slane %v985_v26, %v2330_v50 }
 0x28f   :  { %v1047_v31 = vsel %vm2835_vm2, %v1032_v29, %v1031_v18 }
 0x290   :  { %v1048_v36 = vsel %vm2834_vm3, %v1033_v54, %v1047_v31 }
 0x291   :  { %v1049_v41 = vsel %vm2833_vm4, %v1034_v10, %v1048_v36 }
 0x293   :  { %v997_v30 = vpop.permute.xlu1 %996 }
 0x294   :  { %v1035_v46 = vperm.slane %v997_v30, %v2330_v50  ;;  %v1006_v57 = vpop.permute.xlu0 %1005 }
 0x295   :  { %v1038_v45 = vperm.slane %v1006_v57, %v2330_v50 }
 0x296   :  { %v1050_v47 = vsel %vm2832_vm5, %v1035_v46, %v1049_v41 }
 0x297   :  { %v1051_v53 = vsel %vm2831_vm6, %v1036_v37, %v1050_v47 }
 0x29b   :  { %v1003_v34 = vpop.permute.xlu1 %1002 }
 0x29c   :  { %v1037_v56 = vperm.slane %v1003_v34, %v2330_v50 }
 0x29e   :  { %v1052_v59 = vsel %vm2830_vm7, %v1037_v56, %v1051_v53 }
 0x29f   :  { %v1053_v61 = vsel %vm2829_vm8, %v1038_v45, %v1052_v59 }
 0x2a0   :  { %v1063_v24 = vsel %vm878_vm9, %v1053_v61, 0.0 }
 0x2a1   :  { %1064 = vadd.xlane.f32.xlu0 %v1063_v24 }
 0x2b5   :  { %v1009_v60 = vpop.permute.xlu2 %1008 }
 0x2b6   :  { %v1039_v16 = vperm.slane %v1009_v60, %v2330_v50 }
 0x2bd   :  { %v1018_v48 = vpop.permute.xlu2 %1017 }
 0x2be   :  { %v1042_v8 = vperm.slane %v1018_v48, %v2330_v50 }
 0x2c5   :  { %v1027_v7 = vpop.permute.xlu2 %1026 }
 0x2c6   :  { %v1045_v12 = vperm.slane %v1027_v7, %v2330_v50 }
 0x2cb   :  { %v1015_v19 = vpop.permute.xlu0 %1014 }
 0x2cc   :  { %v1012_v13 = vpop.permute.xlu1 %1011  ;;  %v1041_v44 = vperm.slane %v1015_v19, %v2330_v50 }
 0x2cd   :  { %v1040_v39 = vperm.slane %v1012_v13, %v2330_v50 }
 0x2cf   :  { %v1054_v33 = vsel %vm2835_vm2, %v1040_v39, %v1039_v16 }
 0x2d0   :  { %v1055_v63 = vsel %vm2834_vm3, %v1041_v44, %v1054_v33 }
 0x2d1   :  { %v1056_v21 = vsel %vm2833_vm4, %v1042_v8, %v1055_v63 }
 0x2d3   :  { %v1024_v1 = vpop.permute.xlu0 %1023 }
 0x2d4   :  { %v1021_v2 = vpop.permute.xlu1 %1020  ;;  %v1044_v32 = vperm.slane %v1024_v1, %v2330_v50 }
 0x2d5   :  { %v1043_v27 = vperm.slane %v1021_v2, %v2330_v50 }
 0x2d7   :  { %v1057_v3 = vsel %vm2832_vm5, %v1043_v27, %v1056_v21 }
 0x2d8   :  { %v1058_v23 = vsel %vm2831_vm6, %v1044_v32, %v1057_v3 }
 0x2d9   :  { %v1059_v4 = vsel %vm2830_vm7, %v1045_v12, %v1058_v23 }
 0x2dc   :  { %v1030_v35 = vpop.permute.xlu1 %1029 }
 0x2dd   :  { %v1046_v62 = vperm.slane %v1030_v35, %v2330_v50 }
 0x2df   :  { %v1060_v5 = vsel %vm2829_vm8, %v1046_v62, %v1059_v4 }
 0x2e0   :  { %v1066_v0 = vsel %vm878_vm9, %v1060_v5, 0.0 }
 0x2e1   :  { %1067 = vadd.xlane.f32.xlu2 %v1066_v0 }
 0x314   :  { %v2496_v25 = vpop.xlane.xlu0 %1064 }
 0x315   :  { %v1071_v26 = vperm.slane %v2496_v25, 0  ;;  %v1072_v52 = vperm.slane %v2496_v25, 1  ;;  %v1073_v29 = vperm.slane %v2496_v25, 2  ;;  %v2502_v31 = vperm.slane %v2496_v25, 3 }
 0x316   :  { %v2506_v45 = vperm.slane %v2496_v25, 4  ;;  %v2512_v1 = vperm.slane %v2496_v25, 5  ;;  %v2518_v62 = vperm.slane %v2496_v25, 6 }
 0x317   :  { %1783 = vrcp.f32 %v1071_v26  ;;  %v1112_v43 = vand.u32 2147483647, %v1071_v26  ;;  %v1114_v41 = vand.u32 2147483648, %v1071_v26  ;;  %vm1108_vm11 = vweird.f32 %v1071_v26 }
 0x318   :  { %1785 = vrcp.f32 %v1072_v52  ;;  %v1129_v13 = vand.u32 2147483648, %v1072_v52  ;;  %vm1123_vm15 = vweird.f32 %v1072_v52  ;;  %v1127_v16 = vand.u32 2147483647, %v1072_v52 }
 0x319   :  { %1787 = vrcp.f32 %v1073_v29  ;;  %vm1113_vm13 = vcmp.eq.f32.partialorder %v1112_v43, 8.507059e+37  ;;  %v1115_v53 = vor.u32 1.1754944e-38, %v1114_v41  ;;  %v1144_v32 = vand.u32 2147483648, %v1073_v29 }
 0x31a   :  { %1789 = vrcp.f32 %v2502_v31  ;;  %v1130_v63 = vor.u32 1.1754944e-38, %v1129_v13  ;;  %v1142_v3 = vand.u32 2147483647, %v1073_v29 }
 0x31b   :  { %1791 = vrcp.f32 %v2506_v45  ;;  %v1145_v35 = vor.u32 1.1754944e-38, %v1144_v32 }
 0x31c   :  { %1793 = vrcp.f32 %v2512_v1 }
 0x31d   :  { %v1784_v18 = vpop.eup %1783  ;;  %1795 = vrcp.f32 %v2518_v62 }
 0x31e   :  { %v1786_v30 = vpop.eup %1785  ;;  %v1104_v54 = vmul.f32 %v1784_v18, %v1071_v26  ;;  %vm1109_vm10 = vweird.f32 %v1784_v18  ;;  %v1159_v26 = vand.u32 2147483648, %v2502_v31 }
 0x31f   :  { %v1788_v36 = vpop.eup %1787  ;;  %v1119_v46 = vmul.f32 %v1786_v30, %v1072_v52  ;;  %vm1110_vm12 = vmor %vm1108_vm11, %vm1109_vm10  ;;  %vm1124_vm14 = vweird.f32 %v1786_v30  ;;  %vm1128_vm10 = vcmp.eq.f32.partialorder %v1127_v16, 8.507059e+37 }
 0x320   :  { %v1105_v10 = vsub.f32 1.0, %v1104_v54  ;;  %v1134_v37 = vmul.f32 %v1788_v36, %v1073_v29  ;;  %v1790_v60 = vpop.eup %1789  ;;  %vm1125_vm9 = vmor %vm1123_vm15, %vm1124_vm14  ;;  %vm1139_vm11 = vweird.f32 %v1788_v36  ;;  %vm1143_vm14 = vcmp.eq.f32.partialorder %v1142_v3, 8.507059e+37 }
 0x321   :  { %v1120_v47 = vsub.f32 1.0, %v1119_v46  ;;  %v1149_v33 = vmul.f32 %v1790_v60, %v2502_v31  ;;  %vm1154_vm15 = vweird.f32 %v1790_v60  ;;  %v1160_v46 = vor.u32 1.1754944e-38, %v1159_v26 }
 0x322   :  { %v1106_v57 = vmul.f32 %v1784_v18, %v1105_v10  ;;  %v1135_v24 = vsub.f32 1.0, %v1134_v37 }
 0x323   :  { %v1121_v34 = vmul.f32 %v1786_v30, %v1120_v47  ;;  %v1150_v27 = vsub.f32 1.0, %v1149_v33  ;;  %v1172_v47 = vand.u32 2147483647, %v2506_v45 }
 0x324   :  { %v1107_v56 = vadd.f32 %v1784_v18, %v1106_v57  ;;  %v1136_v44 = vmul.f32 %v1788_v36, %v1135_v24 }
 0x325   :  { %v1122_v61 = vadd.f32 %v1786_v30, %v1121_v34  ;;  %v1151_v23 = vmul.f32 %v1790_v60, %v1150_v27 }
 0x326   :  { %v1111_v59 = vsel %vm1110_vm12, %v1784_v18, %v1107_v56  ;;  %v1137_v8 = vadd.f32 %v1788_v36, %v1136_v44  ;;  %vm1138_vm12 = vweird.f32 %v1073_v29  ;;  %v1157_v29 = vand.u32 2147483647, %v2502_v31 }
 0x327   :  { %v1116_v19 = vsel %vm1113_vm13, %v1115_v53, %v1111_v59  ;;  %v1126_v48 = vsel %vm1125_vm9, %v1786_v30, %v1122_v61  ;;  %vm1140_vm13 = vmor %vm1138_vm12, %vm1139_vm11  ;;  %v1152_v5 = vadd.f32 %v1790_v60, %v1151_v23  ;;  %vm1153_vm9 = vweird.f32 %v2502_v31 }
 0x328   :  { %v1117_v39 = vmul.f32 %v2408_v42, %v1116_v19  ;;  %v1131_v2 = vsel %vm1128_vm10, %v1130_v63, %v1126_v48  ;;  %v1792_v42 = vpop.eup %1791  ;;  %v1141_v7 = vsel %vm1140_vm13, %v1788_v36, %v1137_v8  ;;  %v2525_v18 = vperm.slane %v2496_v25, 7  ;;  %vm1155_vm10 = vmor %vm1153_vm9, %vm1154_vm15 }
 0x329   :  { %v1132_v21 = vmul.f32 %v2406_v38, %v1131_v2  ;;  %v1164_v12 = vmul.f32 %v1792_v42, %v2506_v45  ;;  %v1146_v4 = vsel %vm1143_vm14, %v1145_v35, %v1141_v7  ;;  %v1794_v38 = vpop.eup %1793  ;;  %v1156_v30 = vsel %vm1155_vm10, %v1790_v60, %v1152_v5 }
 0x32a   :  { %1345 = vperm.xlu1 %1716, %v1117_v39   ;;  %v1147_v52 = vmul.f32 %v2411_v49, %v1146_v4  ;;  %v1179_v36 = vmul.f32 %v1794_v38, %v2512_v1  ;;  %vm1158_vm11 = vcmp.eq.f32.partialorder %v1157_v29, 8.507059e+37  ;;  %1797 = vrcp.f32 %v2525_v18  ;;  %v1796_v31 = vpop.eup %1795 }
 0x32b   :  { %v1165_v0 = vsub.f32 1.0, %v1164_v12  ;;  %v1161_v49 = vsel %vm1158_vm11, %v1160_v46, %v1156_v30  ;;  %vm1169_vm12 = vweird.f32 %v1792_v42  ;;  %v1174_v25 = vand.u32 2147483648, %v2506_v45 }
 0x32c   :  { %v1180_v43 = vsub.f32 1.0, %v1179_v36  ;;  %v1162_v41 = vmul.f32 %v2422_v6, %v1161_v49  ;;  %vm1168_vm13 = vweird.f32 %v2506_v45  ;;  %v1194_v34 = vmul.f32 %v1796_v31, %v2518_v62 }
 0x32d   :  { %v1166_v54 = vmul.f32 %v1792_v42, %v1165_v0  ;;  %vm1170_vm14 = vmor %vm1168_vm13, %vm1169_vm12  ;;  %v1175_v53 = vor.u32 1.1754944e-38, %v1174_v25  ;;  %vm1173_vm15 = vcmp.eq.f32.partialorder %v1172_v47, 8.507059e+37  ;;  %vm1184_vm9 = vweird.f32 %v1794_v38 }
 0x32e   :  { %v1181_v37 = vmul.f32 %v1794_v38, %v1180_v43  ;;  %v1195_v24 = vsub.f32 1.0, %v1194_v34  ;;  %v1189_v6 = vand.u32 2147483648, %v2512_v1  ;;  %vm1183_vm10 = vweird.f32 %v2512_v1 }
 0x32f   :  { %v1167_v10 = vadd.f32 %v1792_v42, %v1166_v54  ;;  %v1187_v45 = vand.u32 2147483647, %v2512_v1  ;;  %vm1185_vm11 = vmor %vm1183_vm10, %vm1184_vm9  ;;  %vm1199_vm13 = vweird.f32 %v1796_v31  ;;  %v1204_v2 = vand.u32 2147483648, %v2518_v62 }
 0x330   :  { %v1798_v56 = vpop.eup %1797  ;;  %v1182_v61 = vadd.f32 %v1794_v38, %v1181_v37  ;;  %v1196_v39 = vmul.f32 %v1796_v31, %v1195_v24  ;;  %v1190_v48 = vor.u32 1.1754944e-38, %v1189_v6  ;;  %v1219_v32 = vand.u32 2147483648, %v2525_v18 }
 0x331   :  { %v1171_v57 = vsel %vm1170_vm14, %v1792_v42, %v1167_v10  ;;  %v1209_v60 = vmul.f32 %v1798_v56, %v2525_v18  ;;  %vm1188_vm12 = vcmp.eq.f32.partialorder %v1187_v45, 8.507059e+37  ;;  %vm1198_vm14 = vweird.f32 %v2518_v62 }
 0x332   :  { %1350 = vperm.xlu1 %1716, %v1132_v21   ;;  %v1176_v59 = vsel %vm1173_vm15, %v1175_v53, %v1171_v57  ;;  %v1186_v13 = vsel %vm1185_vm11, %v1794_v38, %v1182_v61  ;;  %v1197_v33 = vadd.f32 %v1796_v31, %v1196_v39  ;;  %vm1200_vm15 = vmor %vm1198_vm14, %vm1199_vm13  ;;  %vm1214_vm9 = vweird.f32 %v1798_v56 }
 0x333   :  { %v1177_v19 = vmul.f32 %v2417_v58, %v1176_v59  ;;  %v1210_v16 = vsub.f32 1.0, %v1209_v60  ;;  %v1191_v44 = vsel %vm1188_vm12, %v1190_v48, %v1186_v13  ;;  %v1202_v58 = vand.u32 2147483647, %v2518_v62 }
 0x334   :  { %v1192_v8 = vmul.f32 %v2429_v40, %v1191_v44  ;;  %v1201_v1 = vsel %vm1200_vm15, %v1796_v31, %v1197_v33  ;;  %v1205_v42 = vor.u32 1.1754944e-38, %v1204_v2  ;;  %vm1213_vm11 = vweird.f32 %v2525_v18 }
 0x335   :  { %v1211_v63 = vmul.f32 %v1798_v56, %v1210_v16  ;;  %vm1203_vm10 = vcmp.eq.f32.partialorder %v1202_v58, 8.507059e+37  ;;  %v1217_v3 = vand.u32 2147483647, %v2525_v18  ;;  %vm1215_vm12 = vmor %vm1213_vm11, %vm1214_vm9  ;;  %v1220_v5 = vor.u32 1.1754944e-38, %v1219_v32 }
 0x336   :  { %v1206_v12 = vsel %vm1203_vm10, %v1205_v42, %v1201_v1 }
 0x337   :  { %v1212_v27 = vadd.f32 %v1798_v56, %v1211_v63  ;;  %v1207_v0 = vmul.f32 %v2426_v28, %v1206_v12  ;;  %vm1218_vm13 = vcmp.eq.f32.partialorder %v1217_v3, 8.507059e+37 }
 0x339   :  { %v1216_v62 = vsel %vm1215_vm12, %v1798_v56, %v1212_v27 }
 0x33a   :  { %1355 = vperm.xlu1 %1716, %v1147_v52   ;;  %v1221_v26 = vsel %vm1218_vm13, %v1220_v5, %v1216_v62 }
 0x33b   :  { %v1222_v46 = vmul.f32 %v2419_v15, %v1221_v26 }
 0x342   :  { %1360 = vperm.xlu1 %1716, %v1162_v41  }
 0x34a   :  { %1365 = vperm.xlu1 %1716, %v1177_v19  }
 0x352   :  { %1370 = vperm.xlu1 %1716, %v1192_v8  }
 0x354   :  { %v1068_v21 = vpop.xlane.xlu2 %1067 }
 0x355   :  { %v2547_v7 = vperm.slane %v1068_v21, 0  ;;  %v2549_v40 = vperm.slane %v1068_v21, 1  ;;  %v2551_v23 = vperm.slane %v1068_v21, 2  ;;  %v2553_v35 = vperm.slane %v1068_v21, 3 }
 0x356   :  { %v2555_v4 = vperm.slane %v1068_v21, 4  ;;  %v2560_v38 = vperm.slane %v1068_v21, 6  ;;  %v2567_v30 = vperm.slane %v1068_v21, 5  ;;  %v2572_v36 = vperm.slane %v1068_v21, 7 }
 0x357   :  { %1799 = vrcp.f32 %v2547_v7  ;;  %v1249_v52 = vand.u32 2147483648, %v2549_v40  ;;  %v1232_v29 = vand.u32 2147483647, %v2547_v7  ;;  %v1234_v18 = vand.u32 2147483648, %v2547_v7 }
 0x358   :  { %1801 = vrcp.f32 %v2549_v40  ;;  %v1247_v28 = vand.u32 2147483647, %v2549_v40  ;;  %v1264_v54 = vand.u32 2147483648, %v2551_v23  ;;  %v1262_v49 = vand.u32 2147483647, %v2551_v23 }
 0x359   :  { %1803 = vrcp.f32 %v2551_v23  ;;  %vm1243_vm14 = vweird.f32 %v2549_v40  ;;  %v1250_v43 = vor.u32 1.1754944e-38, %v1249_v52  ;;  %vm1228_vm15 = vweird.f32 %v2547_v7 }
 0x35a   :  { %1805 = vrcp.f32 %v2553_v35  ;;  %1375 = vperm.xlu1 %1716, %v1207_v0   ;;  %v1279_v31 = vand.u32 2147483648, %v2553_v35  ;;  %vm2581_vm9 = vcmp.eq.f32.partialorder %v1232_v29, 8.507059e+37  ;;  %v1235_v15 = vor.u32 1.1754944e-38, %v1234_v18 }
 0x35b   :  { %1807 = vrcp.f32 %v2555_v4  ;;  %vm1258_vm10 = vweird.f32 %v2551_v23  ;;  %v1277_v57 = vand.u32 2147483647, %v2553_v35  ;;  %vm2589_vm11 = vcmp.eq.f32.partialorder %v1247_v28, 8.507059e+37 }
 0x35c   :  { %1809 = vrcp.f32 %v2560_v38  ;;  %v1265_v53 = vor.u32 1.1754944e-38, %v1264_v54  ;;  %vm1273_vm12 = vweird.f32 %v2553_v35  ;;  %v1292_v59 = vand.u32 2147483647, %v2555_v4 }
 0x35d   :  { %v1800_v10 = vpop.eup %1799  ;;  %1811 = vrcp.f32 %v2567_v30  ;;  %vm2597_vm1 = vcmp.eq.f32.partialorder %v1262_v49, 8.507059e+37  ;;  %vm1288_vm8 = vweird.f32 %v2555_v4  ;;  %v1280_v39 = vor.u32 1.1754944e-38, %v1279_v31 }
 0x35e   :  { %v1802_v25 = vpop.eup %1801  ;;  %v1224_v41 = vmul.f32 %v1800_v10, %v2547_v7  ;;  %1813 = vrcp.f32 %v2572_v36  ;;  %vm1229_vm13 = vweird.f32 %v1800_v10  ;;  %vm2605_vm6 = vcmp.eq.f32.partialorder %v1277_v57, 8.507059e+37 }
 0x35f   :  { %v1804_v37 = vpop.eup %1803  ;;  %v1239_v34 = vmul.f32 %v1802_v25, %v2549_v40  ;;  %vm1244_vm7 = vweird.f32 %v1802_v25  ;;  %v1294_v63 = vand.u32 2147483648, %v2555_v4  ;;  %vm1230_vm3 = vmor %vm1228_vm15, %vm1229_vm13  ;;  %v1324_v62 = vand.u32 2147483648, %v2560_v38 }
 0x360   :  { %v1806_v61 = vpop.eup %1805  ;;  %v1225_v24 = vsub.f32 1.0, %v1224_v41  ;;  %v1254_v60 = vmul.f32 %v1804_v37, %v2551_v23  ;;  %vm1259_vm5 = vweird.f32 %v1804_v37  ;;  %vm1245_vm0 = vmor %vm1243_vm14, %vm1244_vm7  ;;  %v1309_v6 = vand.u32 2147483648, %v2567_v30 }
 0x361   :  { %v2602_v19 = vpop.eup %1807  ;;  %v1240_v45 = vsub.f32 1.0, %v1239_v34  ;;  %v1269_v13 = vmul.f32 %v1806_v61, %v2553_v35  ;;  %vm1274_vm4 = vweird.f32 %v1806_v61  ;;  %vm1260_vm15 = vmor %vm1258_vm10, %vm1259_vm5  ;;  %v1325_v56 = vor.u32 1.1754944e-38, %v1324_v62 }
 0x362   :  { %1380 = vperm.xlu1 %1716, %v1222_v46   ;;  %v1226_v16 = vmul.f32 %v1800_v10, %v1225_v24  ;;  %v1255_v48 = vsub.f32 1.0, %v1254_v60  ;;  %v1284_v33 = vmul.f32 %v2602_v19, %v2555_v4  ;;  %v1810_v2 = vpop.eup %1809  ;;  %vm1289_vm2 = vweird.f32 %v2602_v19 }
 0x363   :  { %v1241_v8 = vmul.f32 %v1802_v25, %v1240_v45  ;;  %v1270_v58 = vsub.f32 1.0, %v1269_v13  ;;  %v1314_v32 = vmul.f32 %v1810_v2, %v2560_v38  ;;  %v2613_v21 = vpop.eup %1811  ;;  %vm1319_vm13 = vweird.f32 %v1810_v2 }
 0x364   :  { %v1227_v1 = vadd.f32 %v1800_v10, %v1226_v16  ;;  %v1256_v27 = vmul.f32 %v1804_v37, %v1255_v48  ;;  %v1285_v42 = vsub.f32 1.0, %v1284_v33  ;;  %v2620_v5 = vpop.eup %1813  ;;  %v1299_v41 = vmul.f32 %v2613_v21, %v2567_v30 }
 0x365   :  { %v1242_v3 = vadd.f32 %v1802_v25, %v1241_v8  ;;  %v1271_v12 = vmul.f32 %v1806_v61, %v1270_v58  ;;  %v1315_v29 = vsub.f32 1.0, %v1314_v32  ;;  %vm1304_vm7 = vweird.f32 %v2613_v21 }
 0x366   :  { %v1231_v0 = vsel %vm1230_vm3, %v1800_v10, %v1227_v1  ;;  %v1257_v26 = vadd.f32 %v1804_v37, %v1256_v27  ;;  %v1286_v52 = vmul.f32 %v2602_v19, %v1285_v42  ;;  %vm1275_vm3 = vmor %vm1273_vm12, %vm1274_vm4  ;;  %v1307_v45 = vand.u32 2147483647, %v2567_v30  ;;  %v1815_v42 = vld [vmem:[%s2823_s0 + $0x8] sm:$0xff] }
 0x367   :  { %v1246_v18 = vsel %vm1245_vm0, %v1802_v25, %v1242_v3  ;;  %v1236_v7 = vsel %vm2581_vm9, %v1235_v15, %v1231_v0  ;;  %v1272_v28 = vadd.f32 %v1806_v61, %v1271_v12  ;;  %vm2645_vm0 = vmor %vm1288_vm8, %vm1289_vm2  ;;  %v1322_v25 = vand.u32 2147483647, %v2560_v38  ;;  %v1818_v12 = vld [vmem:[%s2823_s0 + $0x18] sm:$0xff]  ;;  %v1819_v0 = vld [vmem:[%s2823_s0 + $0x20] sm:$0xff] }
 0x368   :  { %v1251_v54 = vsel %vm2589_vm11, %v1250_v43, %v1246_v18  ;;  %v1237_v40 = vmul.f32 %v2443_v55, %v1236_v7  ;;  %v1261_v46 = vsel %vm1260_vm15, %v1804_v37, %v1257_v26  ;;  %v1287_v49 = vadd.f32 %v2602_v19, %v1286_v52 }
 0x369   :  { %v1252_v10 = vmul.f32 %v2440_v14, %v1251_v54  ;;  %v1266_v23 = vsel %vm2597_vm1, %v1265_v53, %v1261_v46  ;;  %v1276_v31 = vsel %vm1275_vm3, %v1806_v61, %v1272_v28  ;;  %v1316_v55 = vmul.f32 %v1810_v2, %v1315_v29  ;;  %v1820_v54 = vld [vmem:[%s2823_s0 + $0x28] sm:$0xff] }
 0x36a   :  { %1385 = vperm.xlu2 %1717, %v1237_v40   ;;  %v1267_v35 = vmul.f32 %v2438_v11, %v1266_v23  ;;  %v1291_v14 = vsel %vm2645_vm0, %v2602_v19, %v1287_v49  ;;  %v1281_v47 = vsel %vm2605_vm6, %v1280_v39, %v1276_v31  ;;  %v1295_v15 = vor.u32 1.1754944e-38, %v1294_v63 }
 0x36b   :  { %1390 = vperm.xlu0 %1715, %v1252_v10   ;;  %v1317_v57 = vadd.f32 %v1810_v2, %v1316_v55  ;;  %vm1318_vm1 = vweird.f32 %v2560_v38  ;;  %vm1293_vm2 = vcmp.eq.f32.partialorder %v1292_v59, 8.507059e+37  ;;  %v1300_v11 = vsub.f32 1.0, %v1299_v41 }
 0x36c   :  { %1395 = vperm.xlu1 %1716, %v1267_v35   ;;  %vm1320_vm4 = vmor %vm1318_vm1, %vm1319_vm13  ;;  %v1296_v37 = vsel %vm1293_vm2, %v1295_v15, %v1291_v14  ;;  %v1329_v53 = vmul.f32 %v2620_v5, %v2572_v36  ;;  %v1282_v61 = vmul.f32 %v2454_v51, %v1281_v47  ;;  %vm1323_vm5 = vcmp.eq.f32.partialorder %v1322_v25, 8.507059e+37 }
 0x36d   :  { %v1321_v34 = vsel %vm1320_vm4, %v1810_v2, %v1317_v57  ;;  %v1301_v24 = vmul.f32 %v2613_v21, %v1300_v11  ;;  %vm1303_vm6 = vweird.f32 %v2567_v30  ;;  %v1297_v38 = vmul.f32 %v2451_v22, %v1296_v37 }
 0x36e   :  { %v1326_v60 = vsel %vm1323_vm5, %v1325_v56, %v1321_v34  ;;  %v1330_v4 = vsub.f32 1.0, %v1329_v53  ;;  %v1339_v19 = vand.u32 2147483648, %v2572_v36  ;;  %vm1334_vm8 = vweird.f32 %v2620_v5  ;;  %vm1305_vm14 = vmor %vm1303_vm6, %vm1304_vm7  ;;  %v1821_v34 = vld [vmem:[%s2823_s0 + $0x30] sm:$0xff] }
 0x36f   :  { %v1302_v59 = vadd.f32 %v2613_v21, %v1301_v24  ;;  %v1337_v13 = vand.u32 2147483647, %v2572_v36  ;;  %v1327_v39 = vmul.f32 %v2460_v9, %v1326_v60  ;;  %vm1333_vm9 = vweird.f32 %v2572_v36 }
 0x370   :  { %v1331_v51 = vmul.f32 %v2620_v5, %v1330_v4  ;;  %v1310_v48 = vor.u32 1.1754944e-38, %v1309_v6  ;;  %vm1335_vm10 = vmor %vm1333_vm9, %vm1334_vm8  ;;  %v1340_v30 = vor.u32 1.1754944e-38, %v1339_v19  ;;  %vm1308_vm11 = vcmp.eq.f32.partialorder %v1307_v45, 8.507059e+37 }
 0x371   :  { %v1306_v22 = vsel %vm1305_vm14, %v2613_v21, %v1302_v59  ;;  %vm1338_vm12 = vcmp.eq.f32.partialorder %v1337_v13, 8.507059e+37  ;;  %v1816_v21 = vld [vmem:[%s2823_s0 + $0x10] sm:$0xff]  ;;  %vm2847_vm15 = vcmask 261120   ;;  %vm2854_vm5 = vcmask 1041409  }
 0x372   :  { %1405 = vperm.xlu2 %1717, %v1297_v38   ;;  %v1332_v16 = vadd.f32 %v2620_v5, %v1331_v51  ;;  %v1311_v33 = vsel %vm1308_vm11, %v1310_v48, %v1306_v22  ;;  %vm2848_vm13 = vmmov %vm2847_vm15  ;;  %vm2855_vm6 = vcmask 1042434   ;;  %vm2856_vm7 = vcmask 1043459  }
 0x373   :  { %1400 = vperm.xlu0 %1715, %v1282_v61   ;;  %v1312_v2 = vmul.f32 %v2449_v17, %v1311_v33  ;;  %v1817_v17 = vld [vmem:[%s2823_s0] sm:$0xff]  ;;  %vm2849_vm3 = vmmov %vm2848_vm13  ;;  %vm2857_vm8 = vcmask 1044484   ;;  %vm2858_vm14 = vcmask 1045509   ;;  %vm2859_vm9 = vcmask 1046534  }
 0x374   :  { %1415 = vperm.xlu1 %1716, %v1327_v39   ;;  %v1336_v44 = vsel %vm1335_vm10, %v2620_v5, %v1332_v16  ;;  %vm2850_vm0 = vmmov %vm2849_vm3  ;;  %vm2861_vm11 = vcmask 1047559  }
 0x375   :  { %v1341_v63 = vsel %vm1338_vm12, %v1340_v30, %v1336_v44  ;;  %vm2851_vm1 = vmmov %vm2850_vm0 }
 0x376   :  { %v1342_v9 = vmul.f32 %v2458_v20, %v1341_v63  ;;  %vm2852_vm2 = vmmov %vm2850_vm0 }
 0x377   :  { %vm2853_vm4 = vmmov %vm2850_vm0 }
 0x378   :  { %vm2860_vm10 = vmmov %vm2850_vm0 }
 0x379   :  { %vm2862_vm12 = vmmov %vm2850_vm0 }
 0x37a   :  { %1420 = vperm.xlu2 %1717, %v1342_v9  }
 0x37b   :  { %1410 = vperm.xlu0 %1715, %v1312_v2  }
 0x39c   :  { %v1346_v8 = vpop.permute.xlu1 %1345 }
 0x39d   :  { %v1423_v20 = vmul.f32 %v1817_v17, %v1346_v8  ;;  %v1619_v24 = vperm.slane %v1346_v8, %v2330_v50 }
 0x39f   :  { %v1439_v18 = vsel %vm2849_vm3, %v1423_v20, 0.0  ;;  %v1823_v20 = vld [vmem:[%s2823_s0 + $0x40] sm:$0xff]  ;;  %vm2865_vm3 = vmmov %vm2850_vm0 }
 0x3a0   :  { %v1440_v23 = vrot.slane %v1439_v18, 4 }
 0x3a2   :  { %v1441_v41 = vadd.f32 %v1440_v23, %v1439_v18 }
 0x3a4   :  { %v1351_v58 = vpop.permute.xlu1 %1350  ;;  %v1442_v59 = vrot.slane %v1441_v41, 2 }
 0x3a5   :  { %v1424_v32 = vmul.f32 %v1815_v42, %v1351_v58  ;;  %v1620_v11 = vperm.slane %v1351_v58, %v2330_v50  ;;  %v1822_v42 = vld [vmem:[%s2823_s0 + $0x38] sm:$0xff] }
 0x3a6   :  { %v1443_v2 = vadd.f32 %v1442_v59, %v1441_v41 }
 0x3a7   :  { %v1446_v5 = vsel %vm2847_vm15, %v1424_v32, 0.0  ;;  %v1635_v13 = vsel %vm2854_vm5, %v1620_v11, %v1619_v24  ;;  %vm2863_vm15 = vmmov %vm2854_vm5 }
 0x3a8   :  { %v1447_v7 = vrot.slane %v1446_v5, 4  ;;  %v1444_v18 = vrot.slane %v1443_v2, 1  ;;  %vm2869_vm5 = vmmov %vm2851_vm1 }
 0x3aa   :  { %v1448_v43 = vadd.f32 %v1447_v7, %v1446_v5 }
 0x3ac   :  { %v1356_v1 = vpop.permute.xlu1 %1355  ;;  %v1449_v57 = vrot.slane %v1448_v43, 2 }
 0x3ad   :  { %v1425_v3 = vmul.f32 %v1816_v21, %v1356_v1  ;;  %v1621_v53 = vperm.slane %v1356_v1, %v2330_v50 }
 0x3ae   :  { %v1450_v51 = vadd.f32 %v1449_v57, %v1448_v43  ;;  %v1445_v43 = vadd.f32 %v1444_v18, %v1443_v2 }
 0x3af   :  { %v1453_v52 = vsel %vm2848_vm13, %v1425_v3, 0.0  ;;  %v1636_v16 = vsel %vm2855_vm6, %v1621_v53, %v1635_v13  ;;  %vm2864_vm13 = vmmov %vm2855_vm6 }
 0x3b0   :  { %v1454_v49 = vrot.slane %v1453_v52, 4  ;;  %v1451_v17 = vrot.slane %v1450_v51, 1  ;;  %vm2870_vm6 = vmmov %vm2859_vm9 }
 0x3b2   :  { %v1455_v25 = vadd.f32 %v1454_v49, %v1453_v52 }
 0x3b4   :  { %v1361_v36 = vpop.permute.xlu1 %1360  ;;  %v1456_v60 = vrot.slane %v1455_v25, 2 }
 0x3b5   :  { %v1426_v62 = vmul.f32 %v1818_v12, %v1361_v36  ;;  %v1622_v4 = vperm.slane %v1361_v36, %v2330_v50 }
 0x3b6   :  { %v1457_v33 = vadd.f32 %v1456_v60, %v1455_v25  ;;  %v1826_v60 = vld [vmem:[%s2823_s0 + $0x50] sm:$0xff] }
 0x3b7   :  { %v1460_v28 = vsel %vm2850_vm0, %v1426_v62, 0.0  ;;  %v1637_v63 = vsel %vm2856_vm7, %v1622_v4, %v1636_v16  ;;  %vm2866_vm0 = vmmov %vm2856_vm7 }
 0x3b8   :  { %v1461_v31 = vrot.slane %v1460_v28, 4  ;;  %vm2871_vm7 = vmmov %vm2851_vm1 }
 0x3ba   :  { %v1462_v47 = vadd.f32 %v1461_v31, %v1460_v28 }
 0x3bc   :  { %v1366_v27 = vpop.permute.xlu1 %1365  ;;  %v1463_v6 = vrot.slane %v1462_v47, 2 }
 0x3bd   :  { %v1427_v26 = vmul.f32 %v1819_v0, %v1366_v27  ;;  %v1623_v19 = vperm.slane %v1366_v27, %v2330_v50  ;;  %v1458_v0 = vrot.slane %v1457_v33, 1 }
 0x3be   :  { %v1464_v8 = vadd.f32 %v1463_v6, %v1462_v47  ;;  %v1827_v6 = vld [vmem:[%s2823_s0 + $0x78] sm:$0xff] }
 0x3bf   :  { %v1467_v46 = vsel %vm2851_vm1, %v1427_v26, 0.0  ;;  %v1638_v58 = vsel %vm2857_vm8, %v1623_v19, %v1637_v63  ;;  %v1459_v23 = vadd.f32 %v1458_v0, %v1457_v33 }
 0x3c0   :  { %v1468_v55 = vrot.slane %v1467_v46, 4  ;;  %v1465_v7 = vrot.slane %v1464_v8, 1 }
 0x3c2   :  { %v1469_v37 = vadd.f32 %v1468_v55, %v1467_v46  ;;  %v1466_v55 = vadd.f32 %v1465_v7, %v1464_v8 }
 0x3c4   :  { %v1371_v29 = vpop.permute.xlu1 %1370  ;;  %v2707_v35 = vpop.permute.xlu2 %1385  ;;  %v1470_v39 = vrot.slane %v1469_v37, 2 }
 0x3c5   :  { %v1428_v40 = vmul.f32 %v1820_v54, %v1371_v29  ;;  %v1624_v22 = vperm.slane %v1371_v29, %v2330_v50  ;;  %v1431_v12 = vmul.f32 %v1823_v20, %v2707_v35  ;;  %v1828_v20 = vld [vmem:[%s2823_s0 + $0x58] sm:$0xff] }
 0x3c6   :  { %v1471_v27 = vadd.f32 %v1470_v39, %v1469_v37 }
 0x3c7   :  { %v1474_v10 = vsel %vm2852_vm2, %v1428_v40, 0.0  ;;  %v1639_v3 = vsel %vm2858_vm14, %v1624_v22, %v1638_v58  ;;  %v1452_v40 = vadd.f32 %v1451_v17, %v1450_v51  ;;  %v1495_v46 = vsel %vm2862_vm12, %v1431_v12, 0.0  ;;  %vm2867_vm2 = vmmov %vm2857_vm8 }
 0x3c8   :  { %v1475_v14 = vrot.slane %v1474_v10, 4  ;;  %v1472_v54 = vrot.slane %v1471_v27, 1  ;;  %v1496_v41 = vrot.slane %v1495_v46, 4  ;;  %vm2872_vm8 = vmmov %vm2861_vm11 }
 0x3c9   :  { %v1567_v57 = vsel %vm2863_vm15, %v1452_v40, %v1445_v43  ;;  %vm2877_vm12 = vmmov %vm2866_vm0 }
 0x3ca   :  { %v1476_v61 = vadd.f32 %v1475_v14, %v1474_v10  ;;  %v1473_v25 = vadd.f32 %v1472_v54, %v1471_v27  ;;  %v1568_v59 = vsel %vm2864_vm13, %v1459_v23, %v1567_v57  ;;  %v1497_v39 = vadd.f32 %v1496_v41, %v1495_v46 }
 0x3cb   :  { %v1569_v13 = vsel %vm2866_vm0, %v1466_v55, %v1568_v59  ;;  %vm2881_vm0 = vmmov %vm2870_vm6 }
 0x3cc   :  { %v1376_v15 = vpop.permute.xlu1 %1375  ;;  %v1477_v48 = vrot.slane %v1476_v61, 2  ;;  %v2723_v9 = vpop.permute.xlu2 %1405 }
 0x3cd   :  { %v1429_v56 = vmul.f32 %v1821_v34, %v1376_v15  ;;  %v1625_v44 = vperm.slane %v1376_v15, %v2330_v50  ;;  %v1824_v34 = vld [vmem:[%s2823_s0 + $0x48] sm:$0xff] }
 0x3ce   :  { %v1478_v62 = vadd.f32 %v1477_v48, %v1476_v61  ;;  %v1825_v61 = vld [vmem:[%s2823_s0 + $0x60] sm:$0xff]  ;;  %v1570_v48 = vsel %vm2867_vm2, %v1473_v25, %v1569_v13 }
 0x3cf   :  { %v1481_v38 = vsel %vm2853_vm4, %v1429_v56, 0.0  ;;  %v1640_v5 = vsel %vm2859_vm9, %v1625_v44, %v1639_v3  ;;  %v1435_v24 = vmul.f32 %v1825_v61, %v2723_v9  ;;  %vm2868_vm4 = vmmov %vm2858_vm14  ;;  %v1627_v3 = vperm.slane %v2707_v35, %v2330_v50 }
 0x3d0   :  { %v1482_v45 = vrot.slane %v1481_v38, 4  ;;  %v1479_v49 = vrot.slane %v1478_v62, 1  ;;  %vm2873_vm14 = vmmov %vm2863_vm15 }
 0x3d1   :  { %v1523_v63 = vsel %vm2869_vm5, %v1435_v24, 0.0  ;;  %vm2874_vm9 = vmmov %vm2851_vm1 }
 0x3d2   :  { %v1483_v30 = vadd.f32 %v1482_v45, %v1481_v38  ;;  %v1480_v11 = vadd.f32 %v1479_v49, %v1478_v62  ;;  %v1524_v17 = vrot.slane %v1523_v63, 4  ;;  %vm2878_vm15 = vmmov %vm2867_vm2 }
 0x3d3   :  { %vm2883_vm2 = vmmov %vm2873_vm14 }
 0x3d4   :  { %v1484_v1 = vrot.slane %v1483_v30, 2  ;;  %v1381_v36 = vpop.permute.xlu1 %1380  ;;  %v2739_v47 = vpop.permute.xlu2 %1420  ;;  %v1571_v33 = vsel %vm2868_vm4, %v1480_v11, %v1570_v48  ;;  %v1525_v49 = vadd.f32 %v1524_v17, %v1523_v63  ;;  %vm2885_vm5 = vmmov %vm2877_vm12 }
 0x3d5   :  { %v1430_v32 = vmul.f32 %v1822_v42, %v1381_v36  ;;  %v1626_v21 = vperm.slane %v1381_v36, %v2330_v50  ;;  %v1438_v19 = vmul.f32 %v1827_v6, %v2739_v47  ;;  %v1498_v42 = vrot.slane %v1497_v39, 2 }
 0x3d6   :  { %v1485_v26 = vadd.f32 %v1484_v1, %v1483_v30 }
 0x3d7   :  { %v1488_v52 = vsel %vm2860_vm10, %v1430_v32, 0.0  ;;  %v1641_v29 = vsel %vm2861_vm11, %v1626_v21, %v1640_v5  ;;  %v1544_v58 = vsel %vm2871_vm7, %v1438_v19, 0.0  ;;  %vm2875_vm10 = vmmov %vm2851_vm1 }
 0x3d8   :  { %v1489_v28 = vrot.slane %v1488_v52, 4  ;;  %1651 = vxpose.xlu1.b32.start [1/2] (short) (narrow) %v1641_v29, 8  ;;  %v1486_v31 = vrot.slane %v1485_v26, 1  ;;  %v1545_v5 = vrot.slane %v1544_v58, 4  ;;  %vm2876_vm11 = vmmov %vm2864_vm13 }
 0x3d9   :  { %vm2879_vm13 = vmmov %vm2851_vm1 }
 0x3da   :  { %v1490_v10 = vadd.f32 %v1489_v28, %v1488_v52  ;;  %v1487_v38 = vadd.f32 %v1486_v31, %v1485_v26  ;;  %v1829_v26 = vld [vmem:[%s2823_s0 + $0x70] sm:$0xff]  ;;  %v1499_v28 = vadd.f32 %v1498_v42, %v1497_v39  ;;  %v1546_v23 = vadd.f32 %v1545_v5, %v1544_v58 }
 0x3dc   :  { %v1491_v14 = vrot.slane %v1490_v10, 2  ;;  %v1572_v8 = vsel %vm2870_vm6, %v1487_v38, %v1571_v33  ;;  %v1500_v41 = vrot.slane %v1499_v28, 1  ;;  %vm2886_vm6 = vmmov %vm2878_vm15 }
 0x3dd   :  { %v1391_v15 = vpop.permute.xlu0 %1390 }
 0x3de   :  { %v1492_v37 = vadd.f32 %v1491_v14, %v1490_v10  ;;  %v1432_v56 = vmul.f32 %v1824_v34, %v1391_v15  ;;  %v1396_v53 = vpop.permute.xlu1 %1395  ;;  %v1628_v1 = vperm.slane %v1391_v15, %v2330_v50  ;;  %v1631_v15 = vperm.slane %v2723_v9, %v2330_v50 }
 0x3df   :  { %v1433_v4 = vmul.f32 %v1826_v60, %v1396_v53  ;;  %v1629_v0 = vperm.slane %v1396_v53, %v2330_v50  ;;  %v1526_v34 = vrot.slane %v1525_v49, 2  ;;  %v1830_v53 = vld [vmem:[%s2823_s0 + $0x68] sm:$0xff]  ;;  %v1547_v60 = vrot.slane %v1546_v23, 2  ;;  %s1858_s0 = smov [#allocation2]  }
 0x3e0   :  { %v1502_v45 = vsel %vm2865_vm3, %v1432_v56, 0.0  ;;  %v1493_v51 = vrot.slane %v1492_v37, 1  ;;  %v1642_v29 = vsel %vm2873_vm14, %v1628_v1, %v1627_v3  ;;  %v1634_v56 = vperm.slane %v2739_v47, %v2330_v50  ;;  %vm2880_vm3 = vmmov %vm2868_vm4  ;;  %s1691_s6 = sshll.u32 %s1858_s0, 4  ;;  %s1692_s6 = int_to_ptr.vmem [resolvable:$true] %s1691_s6 }
 0x3e1   :  { %v1503_v22 = vrot.slane %v1502_v45, 4  ;;  %v1509_v16 = vsel %vm2851_vm1, %v1433_v4, 0.0  ;;  %v1643_v31 = vsel %vm2876_vm11, %v1629_v0, %v1642_v29  ;;  %vm2882_vm1 = vmmov %vm2872_vm8  ;;  %v1501_v48 = vadd.f32 %v1500_v41, %v1499_v28 }
 0x3e2   :  { %v1510_v30 = vrot.slane %v1509_v16, 4  ;;  %v1494_v44 = vadd.f32 %v1493_v51, %v1492_v37  ;;  %v1548_v33 = vadd.f32 %v1547_v60, %v1546_v23  ;;  %vm2884_vm4 = vmmov %vm2876_vm11 }
 0x3e3   :  { %v1504_v2 = vadd.f32 %v1503_v22, %v1502_v45  ;;  %v1527_v22 = vadd.f32 %v1526_v34, %v1525_v49  ;;  %vm2887_vm7 = vmmov %vm2880_vm3 }
 0x3e4   :  { %v1511_v36 = vadd.f32 %v1510_v30, %v1509_v16  ;;  %v1573_v27 = vsel %vm2872_vm8, %v1494_v44, %v1572_v8  ;;  %v1549_v42 = vrot.slane %v1548_v33, 1  ;;  %vm2888_vm8 = vmmov %vm2881_vm0 }
 0x3e5   :  { %v1505_v32 = vrot.slane %v1504_v2, 2  ;;  %v1401_v21 = vpop.permute.xlu0 %1400  ;;  %1583 = vxpose.xlu0.b32.start [1/2] (short) (narrow) %v1573_v27, 32  ;;  %v1528_v58 = vrot.slane %v1527_v22, 1  ;;  %vm2889_vm14 = vmmov %vm2882_vm1 }
 0x3e6   :  { %v1434_v12 = vmul.f32 %v1828_v20, %v1401_v21  ;;  %v1416_v62 = vpop.permute.xlu1 %1415  ;;  %v1512_v18 = vrot.slane %v1511_v36, 2  ;;  %v1630_v7 = vperm.slane %v1401_v21, %v2330_v50 }
 0x3e7   :  { %v1437_v52 = vmul.f32 %v1829_v26, %v1416_v62  ;;  %v1506_v54 = vadd.f32 %v1505_v32, %v1504_v2  ;;  %v1633_v38 = vperm.slane %v1416_v62, %v2330_v50  ;;  %v1529_v3 = vadd.f32 %v1528_v58, %v1527_v22 }
 0x3e8   :  { %v1516_v35 = vsel %vm2874_vm9, %v1434_v12, 0.0  ;;  %v1513_v55 = vadd.f32 %v1512_v18, %v1511_v36  ;;  %v1644_v14 = vsel %vm2877_vm12, %v1630_v7, %v1643_v31  ;;  %v1550_v62 = vadd.f32 %v1549_v42, %v1548_v33 }
 0x3e9   :  { %v1517_v40 = vrot.slane %v1516_v35, 4  ;;  %v1537_v46 = vsel %vm2875_vm10, %v1437_v52, 0.0  ;;  %v1507_v57 = vrot.slane %v1506_v54, 1  ;;  %v1645_v9 = vsel %vm2878_vm15, %v1631_v15, %v1644_v14 }
 0x3ea   :  { %v1538_v10 = vrot.slane %v1537_v46, 4  ;;  %v1514_v59 = vrot.slane %v1513_v55, 1  ;;  %vm2890_vm9 = vcmask 130048  }
 0x3eb   :  { %v1518_v43 = vadd.f32 %v1517_v40, %v1516_v35  ;;  %v1508_v47 = vadd.f32 %v1507_v57, %v1506_v54  ;;  %vm2891_vm10 = vmmov %vm2890_vm9 }
 0x3ec   :  { %v1539_v25 = vadd.f32 %v1538_v10, %v1537_v46  ;;  %vm2892_vm11 = vmmov %vm2890_vm9 }
 0x3ed   :  { %v1519_v11 = vrot.slane %v1518_v43, 2  ;;  %v1411_v37 = vpop.permute.xlu0 %1410  ;;  %v1574_v63 = vsel %vm2883_vm2, %v1508_v47, %v1501_v48  ;;  %vm2893_vm12 = vmmov %vm2890_vm9 }
 0x3ee   :  { %v1436_v61 = vmul.f32 %v1830_v53, %v1411_v37  ;;  %v1632_v24 = vperm.slane %v1411_v37, %v2330_v50  ;;  %v1540_v6 = vrot.slane %v1539_v25, 2  ;;  %v1515_v50 = vadd.f32 %v1514_v59, %v1513_v55  ;;  %vm2894_vm15 = vmmov %vm2890_vm9 }
 0x3ef   :  { %v1520_v4 = vadd.f32 %v1519_v11, %v1518_v43 }
 0x3f0   :  { %v1530_v19 = vsel %vm2879_vm13, %v1436_v61, 0.0  ;;  %v1646_v45 = vsel %vm2880_vm3, %v1632_v24, %v1645_v9  ;;  %v1541_v44 = vadd.f32 %v1540_v6, %v1539_v25  ;;  %v1575_v36 = vsel %vm2884_vm4, %v1515_v50, %v1574_v63 }
 0x3f1   :  { %v1521_v51 = vrot.slane %v1520_v4, 1  ;;  %v1531_v13 = vrot.slane %v1530_v19, 4  ;;  %v1647_v39 = vsel %vm2881_vm0, %v1633_v38, %v1646_v45 }
 0x3f2   :  { %v1648_v16 = vsel %vm2882_vm1, %v1634_v56, %v1647_v39  ;;  %v1542_v27 = vrot.slane %v1541_v44, 1 }
 0x3f3   :  { %v1532_v30 = vadd.f32 %v1531_v13, %v1530_v19  ;;  %1652 = vxpose.xlu1.b32.end [2/2] (short) (narrow) %v1648_v16, 8  ;;  %v1522_v2 = vadd.f32 %v1521_v51, %v1520_v4 }
 0x3f4   :  { %v1543_v20 = vadd.f32 %v1542_v27, %v1541_v44 }
 0x3f5   :  { %v1533_v8 = vrot.slane %v1532_v30, 2  ;;  %v1576_v21 = vsel %vm2885_vm5, %v1522_v2, %v1575_v36 }
 0x3f6   :  { %v1577_v12 = vsel %vm2886_vm6, %v1529_v3, %v1576_v21 }
 0x3f7   :  { %v1534_v1 = vadd.f32 %v1533_v8, %v1532_v30 }
 0x3f9   :  { %v1535_v32 = vrot.slane %v1534_v1, 1 }
 0x3fb   :  { %v1536_v17 = vadd.f32 %v1535_v32, %v1534_v1 }
 0x3fd   :  { %v1578_v5 = vsel %vm2887_vm7, %v1536_v17, %v1577_v12 }
 0x3fe   :  { %v1579_v0 = vsel %vm2888_vm8, %v1543_v20, %v1578_v5 }
 0x3ff   :  { %v1580_v26 = vsel %vm2889_vm14, %v1550_v62, %v1579_v0 }
 0x400   :  { %1584 = vxpose.xlu0.b32.end [2/2] (short) (narrow) %v1580_v26, 32 }
 0x48f   :  { %v1667_v52 = vpop.trf.xlu1 }
 0x490   :  { %1683 = vst.msk [vmem:[#allocation2] sm:$0xff] %vm2890_vm9, %v1667_v52 }
 0x491   :  { %1696 = dma.vmem_to_hbm [thread:$0]  %s1692_s6, 128, %s1694_s9, [#allocation3]  }
 0x49c   :  { %v1599_v29 = vpop.trf.xlu0 }
 0x49d   :  { %1615 = vst.msk [vmem:[%s2826_s3] sm:$0xff] %vm2891_vm10, %v1599_v29 }
 0x4a4   :  { %v1600_v18 = vpop.trf.xlu0 }
 0x4a5   :  { %1616 = vst.msk [vmem:[%s2826_s3 + $0x8] sm:$0xff] %vm2892_vm11, %v1600_v18 }
 0x4ac   :  { %v1601_v35 = vpop.trf.xlu0 }
 0x4ad   :  { %1617 = vst.msk [vmem:[%s2826_s3 + $0x10] sm:$0xff] %vm2893_vm12, %v1601_v35 }
 0x4b4   :  { %v1602_v7 = vpop.trf.xlu0 }
 0x4b5   :  { %1618 = vst.msk [vmem:[%s2826_s3 + $0x18] sm:$0xff] %vm2894_vm15, %v1602_v7 }
 0x4b6   :  { %1855 = dma.done.wait [#allocation3], 128  }
 0x4b7   :  { %1856 = vsyncadd [#allocation3], 4294967168 }
 0x4b8   :  { %1703 = vsyncpa [#allocation3], 1 }

</bundles_post_ra>
